<compile_context>
chip_gen: v7x
topology: tpu7x:2x2x1
jax: 0.10.0
libtpu: 0.0.40
codegen_flags: <defaults>
</compile_context>

<pallas_src>
import math

import jax
import jax.numpy as jnp
from jax.experimental import pallas as pl
from jax.experimental.pallas import tpu as pltpu

# Model hyper-parameters (small, consistent with the module).
B = 2             # batch
T = 16            # sequence length
E = 64            # embedding_dim
NUM_HEADS = 4
HEAD_DIM = 16     # E == NUM_HEADS * HEAD_DIM
QKV_DIM = (NUM_HEADS + 2 * NUM_HEADS) * HEAD_DIM   # MHA: num_query_groups == num_heads
HIDDEN = 128      # FF intermediate size
EPS = 1e-6
NEG_INF = -1e30


def _rmsnorm(v, w):
  # v: (R, E) f32, w: (1, E) f32 — all elementwise math kept in f32.
  var = jnp.mean(v * v, axis=-1, keepdims=True)
  return v * jax.lax.rsqrt(var + EPS) * w


def transformer_block_kernel(
    x_ref,        # (R, E)        f32   (R = B*T single-shot path, R = T on the grid path)
    bias_ref,     # (R, R)        f32   additive causal bias (block-diagonal if batch folded)
    wqkv_ref,     # (3H, E, D)    bf16  [q heads | k heads | v heads], q pre-scaled
    wo_ref,       # (H, D, E)     bf16
    wgu_ref,      # (E, 2*HIDDEN) bf16  [gate | up]
    wd_ref,       # (HIDDEN, E)   bf16
    pre_w_ref,    # (1, E)        f32
    post_w_ref,   # (1, E)        f32
    out_ref,      # (R, E)        f32
):
  r, _ = x_ref.shape
  h = wo_ref.shape[0]
  hidden = wd_ref.shape[0]

  x = x_ref[...]                                        # (R, E) f32

  # ---- pre-attention RMSNorm (f32) ----
  xn = _rmsnorm(x, pre_w_ref[...])

  # ---- q/k/v projection: ONE head-batched einsum over the stacked (3H, E, D) slab ----
  # NOTE: the lhs broadcast is kept (now bf16): a rank-2 x rank-3 dot_general without a
  # batch dim on both operands is not supported by the Mosaic lowering.
  xn_b = jnp.broadcast_to(xn.astype(jnp.bfloat16)[None], (3 * h,) + xn.shape)
  qkv = jnp.einsum('hre,hed->hrd', xn_b, wqkv_ref[...],
                   preferred_element_type=jnp.float32)  # (3H, R, D) f32
  q = qkv[:h]                                           # leading-axis slices: free
  k = qkv[h:2 * h]
  v = qkv[2 * h:]

  # ---- attention: bf16 MXU operands, f32 accumulate, f32 softmax ----
  s = jnp.einsum('hrd,hsd->hrs', q.astype(jnp.bfloat16), k.astype(jnp.bfloat16),
                 preferred_element_type=jnp.float32)    # (H, R, R)
  s = s + bias_ref[...][None]                           # precomputed causal bias
  m = jnp.max(s, axis=-1, keepdims=True)
  p = jnp.exp(s - m)
  denom = jnp.sum(p, axis=-1, keepdims=True)
  p = p * pl.reciprocal(denom, approx=True)             # EUP slot (otherwise idle)

  o = jnp.einsum('hrs,hsd->hrd', p.astype(jnp.bfloat16), v.astype(jnp.bfloat16),
                 preferred_element_type=jnp.float32)    # (H, R, D)

  # ---- output projection per head, summed over heads (see TODO at top of file) ----
  y = jnp.sum(
      jnp.einsum('hrd,hde->hre', o.astype(jnp.bfloat16), wo_ref[...],
                 preferred_element_type=jnp.float32),
      axis=0)                                           # (R, E)

  # ---- first residual, post-attention RMSNorm (f32) ----
  x1 = x + y
  x1n = _rmsnorm(x1, post_w_ref[...])

  # ---- fused gated FF: single [gate|up] matmul, 128-lane-aligned split ----
  gu = jnp.dot(x1n.astype(jnp.bfloat16), wgu_ref[...],
               preferred_element_type=jnp.float32)      # (R, 2*HIDDEN)
  g = gu[:, :hidden]
  u = gu[:, hidden:]
  h_act = g * jax.nn.sigmoid(g) * u                     # SiLU gate, f32
  ff = jnp.dot(h_act.astype(jnp.bfloat16), wd_ref[...],
               preferred_element_type=jnp.float32)      # (R, E)

  out_ref[...] = (x1 + ff).astype(out_ref.dtype)


def _is_dual_tensorcore_chip() -> bool:
  """True on v7x-class chips (2 TensorCores/chip); False otherwise / on failure."""
  try:
    kind = jax.devices()[0].device_kind.lower()
  except Exception:
    return False
  return ("v7" in kind) or ("7x" in kind)


USE_BATCH_GRID = _is_dual_tensorcore_chip()


@jax.jit
def transformer_block(x, wqkv, wo, wg, wu, wd, pre_w, post_w):
  Bx, Tx, Ex = x.shape
  x2 = x.reshape(Bx * Tx, Ex)

  # ---- wrapper-side layout plumbing (one-time under jit) ----
  # wqkv columns are per-group [q_g | k_g | v_g]; split into per-head slabs, stack q|k|v.
  scale = 1.0 / math.sqrt(HEAD_DIM)
  wqkv_r = wqkv.reshape(Ex, NUM_HEADS, 3, HEAD_DIM)
  wq_h = jnp.transpose(wqkv_r[:, :, 0, :], (1, 0, 2)) * scale   # scale folded into Q
  wk_h = jnp.transpose(wqkv_r[:, :, 1, :], (1, 0, 2))
  wv_h = jnp.transpose(wqkv_r[:, :, 2, :], (1, 0, 2))
  wqkv_h = jnp.concatenate([wq_h, wk_h, wv_h], axis=0).astype(jnp.bfloat16)  # (3H, E, D)
  wo_h = wo.reshape(NUM_HEADS, HEAD_DIM, Ex).astype(jnp.bfloat16)            # (H, D, E)
  wgu = jnp.concatenate([wg, wu], axis=1).astype(jnp.bfloat16)               # (E, 2*HIDDEN)
  wd_b = wd.astype(jnp.bfloat16)                                             # (HIDDEN, E)

  if USE_BATCH_GRID:
    # v7x: one program per batch element; the parallel grid axis is sharded across the
    # two TensorCores.  Plain TxT causal bias (no cross-batch quadrant).
    r = jnp.arange(Tx)
    bias = jnp.where(r[:, None] >= r[None, :], 0.0, NEG_INF).astype(jnp.float32)

    def _const_spec(shape):
      return pl.BlockSpec(shape, lambda b, _s=shape: (0,) * len(_s))

    out2 = pl.pallas_call(
        transformer_block_kernel,
        out_shape=jax.ShapeDtypeStruct((Bx * Tx, Ex), x.dtype),
        grid=(Bx,),
        in_specs=[
            pl.BlockSpec((Tx, Ex), lambda b: (b, 0)),
            _const_spec((Tx, Tx)),
            _const_spec(wqkv_h.shape),
            _const_spec(wo_h.shape),
            _const_spec(wgu.shape),
            _const_spec(wd_b.shape),
            _const_spec(pre_w.shape),
            _const_spec(post_w.shape),
        ],
        out_specs=pl.BlockSpec((Tx, Ex), lambda b: (b, 0)),
        compiler_params=pltpu.CompilerParams(dimension_semantics=("parallel",)),
    )(x2, bias, wqkv_h, wo_h, wgu, wd_b, pre_w, post_w)
  else:
    # v5e / v6e: single invocation; batch folded into the row axis, isolated by a
    # block-diagonal causal bias (precomputed here, outside the kernel).
    row = jnp.arange(Bx * Tx)
    allowed = (row[None, :] <= row[:, None]) & \
              ((row[:, None] // Tx) == (row[None, :] // Tx))
    bias = jnp.where(allowed, 0.0, NEG_INF).astype(jnp.float32)

    vmem = pl.BlockSpec(memory_space=pltpu.MemorySpace.VMEM)
    out2 = pl.pallas_call(
        transformer_block_kernel,
        out_shape=jax.ShapeDtypeStruct((Bx * Tx, Ex), x.dtype),
        in_specs=[vmem] * 8,
        out_specs=vmem,
    )(x2, bias, wqkv_h, wo_h, wgu, wd_b, pre_w, post_w)

  return out2.reshape(Bx, Tx, Ex)


def reference_block(x, wqkv, wo, wg, wu, wd, pre_w, post_w):
  """Pure-JAX f32 reference mirroring the PyTorch forward semantics."""
  def rmsnorm(v, w):
    var = jnp.mean(v * v, axis=-1, keepdims=True)
    return v * jax.lax.rsqrt(var + EPS) * w

  x_norm = rmsnorm(x, pre_w)                                    # (B,T,E)
  qkv = x_norm @ wqkv                                           # (B,T,3*H*D)
  qkv = qkv.reshape(B, T, NUM_HEADS, 3 * HEAD_DIM)
  q = qkv[..., :HEAD_DIM]
  k = qkv[..., HEAD_DIM:2 * HEAD_DIM]
  v = qkv[..., 2 * HEAD_DIM:]
  scale = 1.0 / math.sqrt(HEAD_DIM)
  s = jnp.einsum('bqhd,bkhd->bhqk', q, k) * scale
  causal = jnp.tril(jnp.ones((T, T), dtype=bool))
  s = jnp.where(causal[None, None], s, NEG_INF)
  p = jax.nn.softmax(s, axis=-1)
  attn = jnp.einsum('bhqk,bkhd->bqhd', p, v).reshape(B, T, NUM_HEADS * HEAD_DIM)
  x1 = x + attn @ wo
  x1n = rmsnorm(x1, post_w)
  g = x1n @ wg
  u = x1n @ wu
  ff = (jax.nn.silu(g) * u) @ wd
  return x1 + ff


if __name__ == "__main__":
  key = jax.random.PRNGKey(0)
  keys = jax.random.split(key, 8)

  x = jax.random.normal(keys[0], (B, T, E), dtype=jnp.float32)

  # Deterministic synthetic parameters (shapes follow nn.Linear / RMSNorm in __init__).
  wqkv = jax.random.normal(keys[1], (E, QKV_DIM), dtype=jnp.float32) * 0.02
  wo = jax.random.normal(keys[2], (NUM_HEADS * HEAD_DIM, E), dtype=jnp.float32) * 0.02
  wg = jax.random.normal(keys[3], (E, HIDDEN), dtype=jnp.float32) * 0.02
  wu = jax.random.normal(keys[4], (E, HIDDEN), dtype=jnp.float32) * 0.02
  wd = jax.random.normal(keys[5], (HIDDEN, E), dtype=jnp.float32) * 0.02
  pre_w = 1.0 + 0.1 * jax.random.normal(keys[6], (1, E), dtype=jnp.float32)
  post_w = 1.0 + 0.1 * jax.random.normal(keys[7], (1, E), dtype=jnp.float32)

  out = transformer_block(x, wqkv, wo, wg, wu, wd, pre_w, post_w)
  out = jax.block_until_ready(out)

  ref = reference_block(x, wqkv, wo, wg, wu, wd, pre_w, post_w)
  assert out.shape == (B, T, E)
  max_err = float(jnp.max(jnp.abs(out - ref)))
  # Relaxed tolerance: bf16 MXU operands (f32 accumulation) + approx EUP reciprocal in the
  # softmax, compared against a pure-f32 reference.
  assert jnp.allclose(out, ref, atol=2e-2, rtol=2e-2), max_err

  print("KERNEL_OK")
</pallas_src>

<mosaic_0001>
module attributes {stable_mosaic.version = 11 : i64} {
  func.func @transformer_block_kernel(%arg0: memref<32x64xf32, #tpu.memory_space<vmem>>, %arg1: memref<32x32xf32, #tpu.memory_space<vmem>>, %arg2: memref<12x64x16xbf16, #tpu.memory_space<vmem>>, %arg3: memref<4x16x64xbf16, #tpu.memory_space<vmem>>, %arg4: memref<64x256xbf16, #tpu.memory_space<vmem>>, %arg5: memref<128x64xbf16, #tpu.memory_space<vmem>>, %arg6: memref<1x64xf32, #tpu.memory_space<vmem>>, %arg7: memref<1x64xf32, #tpu.memory_space<vmem>>, %arg8: memref<32x64xf32, #tpu.memory_space<vmem>>) attributes {dimension_semantics = [], scalar_prefetch = 0 : i64, scratch_operands = 0 : i64, tpu.core_type = #tpu.core_type<tc>} {
    %c0 = arith.constant 0 : index
    %c0_0 = arith.constant 0 : index
    %0 = vector.load %arg0[%c0, %c0_0] : memref<32x64xf32, #tpu.memory_space<vmem>>, vector<32x64xf32>
    %c0_1 = arith.constant 0 : index
    %c0_2 = arith.constant 0 : index
    %1 = vector.load %arg6[%c0_1, %c0_2] : memref<1x64xf32, #tpu.memory_space<vmem>>, vector<1x64xf32>
    %2 = arith.mulf %0, %0 : vector<32x64xf32>
    %cst = arith.constant dense<0.000000e+00> : vector<32xf32>
    %3 = vector.multi_reduction <add>, %2, %cst [1] : vector<32x64xf32> to vector<32xf32>
    %4 = vector.shape_cast %3 : vector<32xf32> to vector<32x1xf32>
    %cst_3 = arith.constant 6.400000e+01 : f32
    %5 = vector.broadcast %cst_3 : f32 to vector<32x1xf32>
    %6 = arith.divf %4, %5 : vector<32x1xf32>
    %cst_4 = arith.constant 9.99999997E-7 : f32
    %7 = vector.broadcast %cst_4 : f32 to vector<32x1xf32>
    %8 = arith.addf %6, %7 : vector<32x1xf32>
    %9 = math.rsqrt %8 : vector<32x1xf32>
    %10 = vector.broadcast %9 : vector<32x1xf32> to vector<32x64xf32>
    %11 = arith.mulf %0, %10 : vector<32x64xf32>
    %12 = vector.broadcast %1 : vector<1x64xf32> to vector<32x64xf32>
    %13 = arith.mulf %11, %12 : vector<32x64xf32>
    %14 = arith.truncf %13 : vector<32x64xf32> to vector<32x64xbf16>
    %15 = vector.shape_cast %14 : vector<32x64xbf16> to vector<1x32x64xbf16>
    %16 = vector.shape_cast %15 : vector<1x32x64xbf16> to vector<1x32x64xbf16>
    %17 = vector.broadcast %16 : vector<1x32x64xbf16> to vector<12x32x64xbf16>
    %c0_5 = arith.constant 0 : index
    %c0_6 = arith.constant 0 : index
    %c0_7 = arith.constant 0 : index
    %18 = vector.load %arg2[%c0_5, %c0_6, %c0_7] : memref<12x64x16xbf16, #tpu.memory_space<vmem>>, vector<12x64x16xbf16>
    "tpu.trace_start"() <{level = 10 : i32, message = "hre,hed->hrd"}> : () -> ()
    %cst_8 = arith.constant dense<0.000000e+00> : vector<12x32x16xf32>
    %19 = tpu.matmul %17, %18, %cst_8 {dimension_numbers = #tpu.dot_dimension_numbers<[2], [1], [1], [2], [0, 0, 0, 1, 1, 2], [0], [0]>} : vector<12x32x64xbf16>, vector<12x64x16xbf16>, vector<12x32x16xf32> -> vector<12x32x16xf32>
    "tpu.trace_stop"() : () -> ()
    %20 = vector.extract_strided_slice %19 {offsets = [0, 0, 0], sizes = [4, 32, 16], strides = [1, 1, 1]} : vector<12x32x16xf32> to vector<4x32x16xf32>
    %21 = vector.extract_strided_slice %19 {offsets = [4, 0, 0], sizes = [4, 32, 16], strides = [1, 1, 1]} : vector<12x32x16xf32> to vector<4x32x16xf32>
    %22 = vector.extract_strided_slice %19 {offsets = [8, 0, 0], sizes = [4, 32, 16], strides = [1, 1, 1]} : vector<12x32x16xf32> to vector<4x32x16xf32>
    %23 = arith.truncf %20 : vector<4x32x16xf32> to vector<4x32x16xbf16>
    %24 = arith.truncf %21 : vector<4x32x16xf32> to vector<4x32x16xbf16>
    "tpu.trace_start"() <{level = 10 : i32, message = "hrd,hsd->hrs"}> : () -> ()
    %cst_9 = arith.constant dense<0.000000e+00> : vector<4x32x32xf32>
    %25 = tpu.matmul %23, %24, %cst_9 {dimension_numbers = #tpu.dot_dimension_numbers<[2], [2], [1], [1], [0, 0, 0, 1, 1, 1], [0], [0]>} : vector<4x32x16xbf16>, vector<4x32x16xbf16>, vector<4x32x32xf32> -> vector<4x32x32xf32>
    "tpu.trace_stop"() : () -> ()
    %c0_10 = arith.constant 0 : index
    %c0_11 = arith.constant 0 : index
    %26 = vector.load %arg1[%c0_10, %c0_11] : memref<32x32xf32, #tpu.memory_space<vmem>>, vector<32x32xf32>
    %27 = vector.shape_cast %26 : vector<32x32xf32> to vector<1x32x32xf32>
    %28 = vector.broadcast %27 : vector<1x32x32xf32> to vector<4x32x32xf32>
    %29 = arith.addf %25, %28 : vector<4x32x32xf32>
    %cst_12 = arith.constant dense<0xFF800000> : vector<4x32xf32>
    %30 = vector.multi_reduction <maximumf>, %29, %cst_12 [2] : vector<4x32x32xf32> to vector<4x32xf32>
    %31 = vector.shape_cast %30 : vector<4x32xf32> to vector<4x32x1xf32>
    %32 = vector.broadcast %31 : vector<4x32x1xf32> to vector<4x32x32xf32>
    %33 = arith.subf %29, %32 : vector<4x32x32xf32>
    %34 = math.exp %33 : vector<4x32x32xf32>
    %cst_13 = arith.constant dense<0.000000e+00> : vector<4x32xf32>
    %35 = vector.multi_reduction <add>, %34, %cst_13 [2] : vector<4x32x32xf32> to vector<4x32xf32>
    %36 = vector.shape_cast %35 : vector<4x32xf32> to vector<4x32x1xf32>
    %37 = tpu.reciprocal %36 {approx = true} : vector<4x32x1xf32> -> vector<4x32x1xf32>
    %38 = vector.broadcast %37 : vector<4x32x1xf32> to vector<4x32x32xf32>
    %39 = arith.mulf %34, %38 : vector<4x32x32xf32>
    %40 = arith.truncf %39 : vector<4x32x32xf32> to vector<4x32x32xbf16>
    %41 = arith.truncf %22 : vector<4x32x16xf32> to vector<4x32x16xbf16>
    "tpu.trace_start"() <{level = 10 : i32, message = "hrs,hsd->hrd"}> : () -> ()
    %cst_14 = arith.constant dense<0.000000e+00> : vector<4x32x16xf32>
    %42 = tpu.matmul %40, %41, %cst_14 {dimension_numbers = #tpu.dot_dimension_numbers<[2], [1], [1], [2], [0, 0, 0, 1, 1, 2], [0], [0]>} : vector<4x32x32xbf16>, vector<4x32x16xbf16>, vector<4x32x16xf32> -> vector<4x32x16xf32>
    "tpu.trace_stop"() : () -> ()
    %43 = arith.truncf %42 : vector<4x32x16xf32> to vector<4x32x16xbf16>
    %c0_15 = arith.constant 0 : index
    %c0_16 = arith.constant 0 : index
    %c0_17 = arith.constant 0 : index
    %44 = vector.load %arg3[%c0_15, %c0_16, %c0_17] : memref<4x16x64xbf16, #tpu.memory_space<vmem>>, vector<4x16x64xbf16>
    "tpu.trace_start"() <{level = 10 : i32, message = "hrd,hde->hre"}> : () -> ()
    %cst_18 = arith.constant dense<0.000000e+00> : vector<4x32x64xf32>
    %45 = tpu.matmul %43, %44, %cst_18 {dimension_numbers = #tpu.dot_dimension_numbers<[2], [1], [1], [2], [0, 0, 0, 1, 1, 2], [0], [0]>} : vector<4x32x16xbf16>, vector<4x16x64xbf16>, vector<4x32x64xf32> -> vector<4x32x64xf32>
    "tpu.trace_stop"() : () -> ()
    %cst_19 = arith.constant dense<0.000000e+00> : vector<32x64xf32>
    %46 = vector.multi_reduction <add>, %45, %cst_19 [0] : vector<4x32x64xf32> to vector<32x64xf32>
    %47 = arith.addf %0, %46 : vector<32x64xf32>
    %c0_20 = arith.constant 0 : index
    %c0_21 = arith.constant 0 : index
    %48 = vector.load %arg7[%c0_20, %c0_21] : memref<1x64xf32, #tpu.memory_space<vmem>>, vector<1x64xf32>
    %49 = arith.mulf %47, %47 : vector<32x64xf32>
    %cst_22 = arith.constant dense<0.000000e+00> : vector<32xf32>
    %50 = vector.multi_reduction <add>, %49, %cst_22 [1] : vector<32x64xf32> to vector<32xf32>
    %51 = vector.shape_cast %50 : vector<32xf32> to vector<32x1xf32>
    %cst_23 = arith.constant 6.400000e+01 : f32
    %52 = vector.broadcast %cst_23 : f32 to vector<32x1xf32>
    %53 = arith.divf %51, %52 : vector<32x1xf32>
    %cst_24 = arith.constant 9.99999997E-7 : f32
    %54 = vector.broadcast %cst_24 : f32 to vector<32x1xf32>
    %55 = arith.addf %53, %54 : vector<32x1xf32>
    %56 = math.rsqrt %55 : vector<32x1xf32>
    %57 = vector.broadcast %56 : vector<32x1xf32> to vector<32x64xf32>
    %58 = arith.mulf %47, %57 : vector<32x64xf32>
    %59 = vector.broadcast %48 : vector<1x64xf32> to vector<32x64xf32>
    %60 = arith.mulf %58, %59 : vector<32x64xf32>
    %61 = arith.truncf %60 : vector<32x64xf32> to vector<32x64xbf16>
    %c0_25 = arith.constant 0 : index
    %c0_26 = arith.constant 0 : index
    %62 = vector.load %arg4[%c0_25, %c0_26] : memref<64x256xbf16, #tpu.memory_space<vmem>>, vector<64x256xbf16>
    %cst_27 = arith.constant dense<0.000000e+00> : vector<32x256xf32>
    %63 = tpu.matmul %61, %62, %cst_27 {dimension_numbers = #tpu.dot_dimension_numbers<[1], [0], [0], [1], [0, 0, 1, 1], [], []>} : vector<32x64xbf16>, vector<64x256xbf16>, vector<32x256xf32> -> vector<32x256xf32>
    %64 = vector.extract_strided_slice %63 {offsets = [0, 0], sizes = [32, 128], strides = [1, 1]} : vector<32x256xf32> to vector<32x128xf32>
    %65 = vector.extract_strided_slice %63 {offsets = [0, 128], sizes = [32, 128], strides = [1, 1]} : vector<32x256xf32> to vector<32x128xf32>
    %66 = arith.negf %64 : vector<32x128xf32>
    %67 = math.exp %66 : vector<32x128xf32>
    %cst_28 = arith.constant 1.000000e+00 : f32
    %68 = vector.broadcast %cst_28 : f32 to vector<32x128xf32>
    %69 = arith.addf %68, %67 : vector<32x128xf32>
    %70 = arith.divf %68, %69 : vector<32x128xf32>
    %71 = arith.mulf %64, %70 : vector<32x128xf32>
    %72 = arith.mulf %71, %65 : vector<32x128xf32>
    %73 = arith.truncf %72 : vector<32x128xf32> to vector<32x128xbf16>
    %c0_29 = arith.constant 0 : index
    %c0_30 = arith.constant 0 : index
    %74 = vector.load %arg5[%c0_29, %c0_30] : memref<128x64xbf16, #tpu.memory_space<vmem>>, vector<128x64xbf16>
    %cst_31 = arith.constant dense<0.000000e+00> : vector<32x64xf32>
    %75 = tpu.matmul %73, %74, %cst_31 {dimension_numbers = #tpu.dot_dimension_numbers<[1], [0], [0], [1], [0, 0, 1, 1], [], []>} : vector<32x128xbf16>, vector<128x64xbf16>, vector<32x64xf32> -> vector<32x64xf32>
    %76 = arith.addf %47, %75 : vector<32x64xf32>
    %c0_32 = arith.constant 0 : index
    %c0_33 = arith.constant 0 : index
    %77 = vector.load %arg8[%c0_32, %c0_33] : memref<32x64xf32, #tpu.memory_space<vmem>>, vector<32x64xf32>
    tpu.vector_store %arg8[%c0_32, %c0_33], %76 {strides = array<i32>} : memref<32x64xf32, #tpu.memory_space<vmem>>, vector<32x64xf32>,
    return
  }
}

</mosaic_0001>

<bundles_post_ra>
// kernel: transformer_block.1
= control target key start
LH: loop header
LB: loop body
LE: loop exit
PB: predicated region body
PF: predicated region fallthrough
CT: control target
= control target key end

     0   :  { %vm40_vm0 = vcmask 523264   ;;  %s3739_s0 = inlined_call_operand.vmem [shape: f32[32,64], index: 0, kind: input, shape index: {}]   ;;  %s3740_s1 = inlined_call_operand.vmem [shape: f32[32,32], index: 1, kind: input, shape index: {}]   ;;  %s3741_s2 = inlined_call_operand.vmem [shape: bf16[12,64,16], index: 2, kind: input, shape index: {}]   ;;  %s3742_s3 = inlined_call_operand.vmem [shape: bf16[4,16,64], index: 3, kind: input, shape index: {}]   ;;  %s3743_s4 = inlined_call_operand.vmem [shape: bf16[64,256], index: 4, kind: input, shape index: {}]   ;;  %s3744_s5 = inlined_call_operand.vmem [shape: bf16[128,64], index: 5, kind: input, shape index: {}]   ;;  %s3745_s6 = inlined_call_operand.vmem [shape: f32[1,64], index: 6, kind: input, shape index: {}]   ;;  %s3746_s7 = inlined_call_operand.vmem [shape: f32[1,64], index: 7, kind: input, shape index: {}]   ;;  %s3747_s8 = inlined_call_operand.hbm [shape: f32[32,64], index: 8, kind: output, shape index: {}]  }
   0x1   :  { %v3115_v0 = vld [vmem:[%s3739_s0 + $0x10] sm:$0xff]  ;;  %v3120_v1 = vld [vmem:[%s3739_s0] sm:$0xff]  ;;  %v3125_v2 = vld [vmem:[%s3739_s0 + $0x18] sm:$0xff] }
   0x2   :  { %v38_v3 = vmul.f32 %v3115_v0, %v3115_v0  ;;  %v36_v4 = vmul.f32 %v3120_v1, %v3120_v1  ;;  %v39_v5 = vmul.f32 %v3125_v2, %v3125_v2  ;;  %v3136_v6 = vld [vmem:[%s3739_s0 + $0x8] sm:$0xff]  ;;  %v2867_v12 = vld [vmem:[%s3741_s2] sm:$0xff]   ;;  %v2871_v16 = vld [vmem:[%s3741_s2 + $0x10] sm:$0xff]  }
   0x3   :  { %v37_v7 = vmul.f32 %v3136_v6, %v3136_v6  ;;  %v2868_v13 = vld [vmem:[%s3741_s2 + $0x20] sm:$0xff]   ;;  %2603 = vmatprep.subr.bf16.mxu0 %v2867_v12  ;;  %v2869_v14 = vld [vmem:[%s3741_s2 + $0x8] sm:$0xff]   ;;  %v2872_v17 = vld [vmem:[%s3741_s2 + $0x30] sm:$0xff]  }
   0x4   :  { %v47_v8 = vsel %vm40_vm0, %v38_v3, 0.0  ;;  %v41_v9 = vsel %vm40_vm0, %v36_v4, 0.0  ;;  %v50_v10 = vsel %vm40_vm0, %v39_v5, 0.0  ;;  %2615 = vmatprep.subr.bf16.mxu1 %v2868_v13  ;;  %2604 = vmatpush3.bf16.msra.mxu0 %v2867_v12  ;;  %v2870_v15 = vld [vmem:[%s3741_s2 + $0x28] sm:$0xff]   ;;  %v2873_v18 = vld [vmem:[%s3741_s2 + $0x18] sm:$0xff]   ;;  %v2875_v20 = vld [vmem:[%s3741_s2 + $0x40] sm:$0xff]  }
   0x5   :  { %48 = vadd.xlane.f32.xlu1 %v47_v8  ;;  %42 = vadd.xlane.f32.xlu0 %v41_v9  ;;  %v44_v11 = vsel %vm40_vm0, %v37_v7, 0.0  ;;  %v2874_v19 = vld [vmem:[%s3741_s2 + $0x38] sm:$0xff]   ;;  %v2876_v21 = vld [vmem:[%s3741_s2 + $0x60] sm:$0xff]  }
   0x6   :  { %2616 = vmatpush3.bf16.msra.mxu1 %v2868_v13  ;;  %2605 = vmatprep.subr.bf16.mxu0 %v2869_v14 }
   0x7   :  { %2617 = vmatprep.subr.bf16.mxu1 %v2870_v15 }
   0x8   :  { %2606 = vmatpush3.bf16.msra.mxu0 %v2869_v14 }
   0x9   :  { %51 = vadd.xlane.f32.xlu1 %v50_v10  ;;  %45 = vadd.xlane.f32.xlu0 %v44_v11 }
   0xa   :  { %2618 = vmatpush3.bf16.msra.mxu1 %v2870_v15  ;;  %2607 = vmatprep.subr.bf16.mxu0 %v2871_v16 }
   0xb   :  { %2619 = vmatprep.subr.bf16.mxu1 %v2872_v17 }
   0xc   :  { %2608 = vmatpush3.bf16.msra.mxu0 %v2871_v16 }
   0xd   :  { %2609 = vmatprep.subr.bf16.mxu0 %v2873_v18 }
   0xe   :  { %2620 = vmatpush3.bf16.msra.mxu1 %v2872_v17 }
   0xf   :  { %2621 = vmatprep.subr.bf16.mxu1 %v2874_v19 }
  0x10   :  { %2610 = vmatpush3.bf16.msra.mxu0 %v2873_v18 }
  0x11   :  { %2627 = vmatprep.subr.bf16.mxu0 %v2875_v20 }
  0x12   :  { %2622 = vmatpush3.bf16.msra.mxu1 %v2874_v19 }
  0x13   :  { %2639 = vmatprep.subr.bf16.mxu1 %v2876_v21 }
  0x14   :  { %13 = vsyncpa [#allocation3], 0  ;;  %v2353_v38 = vld [vmem:[%s3745_s6] ss:$0 sm:$0xff]  ;;  %v2877_v49 = vld [vmem:[%s3741_s2 + $0x48] sm:$0xff]   ;;  %vm1080_vm1 = vcmask 130048  }
  0x15   :  { %v2878_v50 = vld [vmem:[%s3741_s2 + $0x68] sm:$0xff]   ;;  %v2879_v51 = vld [vmem:[%s3741_s2 + $0x50] sm:$0xff]   ;;  %v2881_v53 = vld [vmem:[%s3741_s2 + $0x58] sm:$0xff]   ;;  %vm1325_vm2 = vcmask 261120  }
  0x16   :  { %v2880_v52 = vld [vmem:[%s3741_s2 + $0x70] sm:$0xff]   ;;  %v2882_v54 = vld [vmem:[%s3741_s2 + $0x78] sm:$0xff]   ;;  %v2883_v55 = vld [vmem:[%s3741_s2 + $0x80] sm:$0xff]  }
  0x17   :  { %v2884_v56 = vld [vmem:[%s3741_s2 + $0xa0] sm:$0xff]   ;;  %v2885_v57 = vld [vmem:[%s3741_s2 + $0x88] sm:$0xff]   ;;  %v2887_v59 = vld [vmem:[%s3741_s2 + $0x90] sm:$0xff]  }
  0x18   :  { %v2886_v58 = vld [vmem:[%s3741_s2 + $0xa8] sm:$0xff]   ;;  %v2888_v60 = vld [vmem:[%s3741_s2 + $0xb0] sm:$0xff]   ;;  %v2889_v61 = vld [vmem:[%s3741_s2 + $0x98] sm:$0xff]  }
  0x19   :  { %v2890_v62 = vld [vmem:[%s3741_s2 + $0xb8] sm:$0xff]   ;;  %v2891_v63 = vld [vmem:[%s3741_s2 + $0xc0] sm:$0xff]   ;;  %v2895_v3 = vld [vmem:[%s3741_s2 + $0xd0] sm:$0xff]  }
  0x1a   :  { %v2896_v4 = vld [vmem:[%s3741_s2 + $0xf0] sm:$0xff]   ;;  %v2897_v5 = vld [vmem:[%s3741_s2 + $0xd8] sm:$0xff]   ;;  %v2899_v7 = vld [vmem:[%s3741_s2 + $0x100] sm:$0xff]  }
  0x1b   :  { %v2900_v8 = vld [vmem:[%s3741_s2 + $0x120] sm:$0xff]   ;;  %v2901_v9 = vld [vmem:[%s3741_s2 + $0x108] sm:$0xff]   ;;  %v2903_v11 = vld [vmem:[%s3741_s2 + $0x110] sm:$0xff]  }
  0x1c   :  { %v2902_v10 = vld [vmem:[%s3741_s2 + $0x128] sm:$0xff]   ;;  %v2904_v12 = vld [vmem:[%s3741_s2 + $0x130] sm:$0xff]   ;;  %v2905_v13 = vld [vmem:[%s3741_s2 + $0x118] sm:$0xff]  }
  0x1d   :  { %v2906_v14 = vld [vmem:[%s3741_s2 + $0x138] sm:$0xff]   ;;  %v2907_v15 = vld [vmem:[%s3741_s2 + $0x140] sm:$0xff]   ;;  %v2909_v17 = vld [vmem:[%s3741_s2 + $0x148] sm:$0xff]  }
  0x1e   :  { %v2908_v16 = vld [vmem:[%s3741_s2 + $0x160] sm:$0xff]   ;;  %v2910_v18 = vld [vmem:[%s3741_s2 + $0x168] sm:$0xff]   ;;  %v2911_v19 = vld [vmem:[%s3741_s2 + $0x150] sm:$0xff]  }
  0x92   :  { %v49_v22 = vpop.xlane.xlu1 %48  ;;  %v43_v23 = vpop.xlane.xlu0 %42 }
  0x93   :  { %v56_v24 = vmul.f32 0.015625, %v49_v22  ;;  %v54_v25 = vmul.f32 0.015625, %v43_v23  ;;  %v2914_v22 = vld [vmem:[%s3741_s2 + $0x178] sm:$0xff]  }
  0x95   :  { %v60_v26 = vadd.f32 1e-06, %v56_v24  ;;  %v58_v27 = vadd.f32 1e-06, %v54_v25 }
  0x96   :  { %v52_v28 = vpop.xlane.xlu1 %51  ;;  %v46_v29 = vpop.xlane.xlu0 %45 }
  0x97   :  { %2939 = vrsqrt.f32 %v60_v26  ;;  %v57_v30 = vmul.f32 0.015625, %v52_v28  ;;  %v55_v31 = vmul.f32 0.015625, %v46_v29 }
  0x98   :  { %2941 = vrsqrt.f32 %v58_v27 }
  0x99   :  { %v61_v32 = vadd.f32 1e-06, %v57_v30  ;;  %v59_v33 = vadd.f32 1e-06, %v55_v31 }
  0x9b   :  { %2943 = vrsqrt.f32 %v61_v32 }
  0x9c   :  { %2945 = vrsqrt.f32 %v59_v33 }
  0xa1   :  { %v2940_v34 = vpop.eup %2939 }
  0xa2   :  { %v2942_v35 = vpop.eup %2941  ;;  %v68_v36 = vmul.f32 %v2940_v34, %v3115_v0  ;;  %v2892_v0 = vld [vmem:[%s3741_s2 + $0xe0] sm:$0xff]  }
  0xa3   :  { %v66_v39 = vmul.f32 %v2942_v35, %v3120_v1  ;;  %v2893_v1 = vld [vmem:[%s3741_s2 + $0xc8] sm:$0xff]  }
  0xa4   :  { %v78_v43 = vmul.f32 %v2353_v38, %v68_v36 }
  0xa5   :  { %v2944_v37 = vpop.eup %2943  ;;  %v76_v45 = vmul.f32 %v2353_v38, %v66_v39 }
  0xa6   :  { %v2946_v40 = vpop.eup %2945  ;;  %v69_v41 = vmul.f32 %v2944_v37, %v3125_v2  ;;  %v2894_v2 = vld [vmem:[%s3741_s2 + $0xe8] sm:$0xff]  }
  0xa7   :  { %v67_v42 = vmul.f32 %v2946_v40, %v3136_v6  ;;  %v2898_v6 = vld [vmem:[%s3741_s2 + $0xf8] sm:$0xff]  }
  0xa8   :  { %v79_v44 = vmul.f32 %v2353_v38, %v69_v41 }
  0xa9   :  { %v77_v46 = vmul.f32 %v2353_v38, %v67_v42 }
  0xaa   :  { %v3181_v47 = vpack.c.bf16 %v79_v44, %v78_v43 }
  0xab   :  { %v3183_v48 = vpack.c.bf16 %v77_v46, %v76_v45 }
  0xad   :  { %2611 = vmatprep.mubr.msk.bf16.mxu0 %vm40_vm0, %v3183_v48  ;;  %2623 = vmatprep.mubr.msk.bf16.mxu1 %vm40_vm0, %v3183_v48 }
  0xae   :  { %2612 = vmatmul.mubr.msk.bf16.vlgmr.msra.gmra.mrb[0].mxu0 %vm40_vm0, %v3181_v47  ;;  %2624 = vmatmul.mubr.msk.bf16.vlgmr.msra.gmra.mrb[0].mxu1 %vm40_vm0, %v3181_v47 }
  0xaf   :  { %2628 = vmatpush3.bf16.msra.mxu0 %v2875_v20  ;;  %2640 = vmatpush3.bf16.msra.mxu1 %v2876_v21  ;;  %v2912_v20 = vld [vmem:[%s3741_s2 + $0x170] sm:$0xff]   ;;  %v2913_v21 = vld [vmem:[%s3741_s2 + $0x158] sm:$0xff]  }
  0xb0   :  { %2635 = vmatprep.mubr.msk.bf16.mxu0 %vm40_vm0, %v3183_v48  ;;  %2647 = vmatprep.mubr.msk.bf16.mxu1 %vm40_vm0, %v3183_v48 }
  0xb1   :  { %2629 = vmatprep.subr.bf16.mxu0 %v2877_v49  ;;  %2641 = vmatprep.subr.bf16.mxu1 %v2878_v50 }
  0xb3   :  { %2630 = vmatpush3.bf16.msra.mxu0 %v2877_v49  ;;  %2642 = vmatpush3.bf16.msra.mxu1 %v2878_v50 }
  0xb4   :  { %2631 = vmatprep.subr.bf16.mxu0 %v2879_v51  ;;  %2643 = vmatprep.subr.bf16.mxu1 %v2880_v52 }
  0xb7   :  { %2632 = vmatpush3.bf16.msra.mxu0 %v2879_v51  ;;  %2644 = vmatpush3.bf16.msra.mxu1 %v2880_v52 }
  0xb8   :  { %2633 = vmatprep.subr.bf16.mxu0 %v2881_v53  ;;  %2645 = vmatprep.subr.bf16.mxu1 %v2882_v54 }
  0xbb   :  { %2634 = vmatpush3.bf16.msra.mxu0 %v2881_v53  ;;  %2646 = vmatpush3.bf16.msra.mxu1 %v2882_v54 }
  0xbc   :  { %2651 = vmatprep.subr.bf16.mxu0 %v2883_v55  ;;  %2663 = vmatprep.subr.bf16.mxu1 %v2884_v56 }
  0xbe   :  { %2636 = vmatmul.mubr.msk.bf16.vlgmr.msra.gmra.mrb[4].mxu0 %vm40_vm0, %v3181_v47  ;;  %2648 = vmatmul.mubr.msk.bf16.vlgmr.msra.gmra.mrb[4].mxu1 %vm40_vm0, %v3181_v47 }
  0xbf   :  { %2652 = vmatpush3.bf16.msra.mxu0 %v2883_v55  ;;  %2659 = vmatprep.mubr.msk.bf16.mxu0 %vm40_vm0, %v3183_v48 }
  0xc0   :  { %2664 = vmatpush3.bf16.msra.mxu1 %v2884_v56  ;;  %2671 = vmatprep.mubr.msk.bf16.mxu1 %vm40_vm0, %v3183_v48 }
  0xc1   :  { %2653 = vmatprep.subr.bf16.mxu0 %v2885_v57  ;;  %2665 = vmatprep.subr.bf16.mxu1 %v2886_v58 }
  0xc3   :  { %2654 = vmatpush3.bf16.msra.mxu0 %v2885_v57 }
  0xc4   :  { %2666 = vmatpush3.bf16.msra.mxu1 %v2886_v58  ;;  %2655 = vmatprep.subr.bf16.mxu0 %v2887_v59 }
  0xc5   :  { %2667 = vmatprep.subr.bf16.mxu1 %v2888_v60 }
  0xc7   :  { %2656 = vmatpush3.bf16.msra.mxu0 %v2887_v59 }
  0xc8   :  { %2668 = vmatpush3.bf16.msra.mxu1 %v2888_v60  ;;  %2657 = vmatprep.subr.bf16.mxu0 %v2889_v61 }
  0xc9   :  { %2669 = vmatprep.subr.bf16.mxu1 %v2890_v62 }
  0xcb   :  { %2658 = vmatpush3.bf16.msra.mxu0 %v2889_v61 }
  0xcc   :  { %2670 = vmatpush3.bf16.msra.mxu1 %v2890_v62  ;;  %2675 = vmatprep.subr.bf16.mxu0 %v2891_v63 }
  0xcd   :  { %2687 = vmatprep.subr.bf16.mxu1 %v2892_v0 }
  0xce   :  { %2660 = vmatmul.mubr.msk.bf16.vlgmr.msra.gmra.mrb[8].mxu0 %vm40_vm0, %v3181_v47 }
  0xcf   :  { %2672 = vmatmul.mubr.msk.bf16.vlgmr.msra.gmra.mrb[8].mxu1 %vm40_vm0, %v3181_v47  ;;  %2676 = vmatpush3.bf16.msra.mxu0 %v2891_v63 }
  0xd0   :  { %2683 = vmatprep.mubr.msk.bf16.mxu0 %vm40_vm0, %v3183_v48  ;;  %2688 = vmatpush3.bf16.msra.mxu1 %v2892_v0 }
  0xd1   :  { %2695 = vmatprep.mubr.msk.bf16.mxu1 %vm40_vm0, %v3183_v48  ;;  %2677 = vmatprep.subr.bf16.mxu0 %v2893_v1 }
  0xd2   :  { %2689 = vmatprep.subr.bf16.mxu1 %v2894_v2 }
  0xd3   :  { %2678 = vmatpush3.bf16.msra.mxu0 %v2893_v1 }
  0xd4   :  { %2690 = vmatpush3.bf16.msra.mxu1 %v2894_v2  ;;  %2679 = vmatprep.subr.bf16.mxu0 %v2895_v3 }
  0xd5   :  { %2691 = vmatprep.subr.bf16.mxu1 %v2896_v4 }
  0xd7   :  { %2680 = vmatpush3.bf16.msra.mxu0 %v2895_v3 }
  0xd8   :  { %2692 = vmatpush3.bf16.msra.mxu1 %v2896_v4  ;;  %2681 = vmatprep.subr.bf16.mxu0 %v2897_v5 }
  0xd9   :  { %2693 = vmatprep.subr.bf16.mxu1 %v2898_v6 }
  0xdb   :  { %2682 = vmatpush3.bf16.msra.mxu0 %v2897_v5 }
  0xdc   :  { %2694 = vmatpush3.bf16.msra.mxu1 %v2898_v6  ;;  %2699 = vmatprep.subr.bf16.mxu0 %v2899_v7 }
  0xdd   :  { %2711 = vmatprep.subr.bf16.mxu1 %v2900_v8 }
  0xde   :  { %2684 = vmatmul.mubr.msk.bf16.vlgmr.msra.gmra.mrb[12].mxu0 %vm40_vm0, %v3181_v47 }
  0xdf   :  { %2696 = vmatmul.mubr.msk.bf16.vlgmr.msra.gmra.mrb[12].mxu1 %vm40_vm0, %v3181_v47  ;;  %2700 = vmatpush3.bf16.msra.mxu0 %v2899_v7 }
  0xe0   :  { %2707 = vmatprep.mubr.msk.bf16.mxu0 %vm40_vm0, %v3183_v48  ;;  %2712 = vmatpush3.bf16.msra.mxu1 %v2900_v8 }
  0xe1   :  { %2719 = vmatprep.mubr.msk.bf16.mxu1 %vm40_vm0, %v3183_v48  ;;  %2701 = vmatprep.subr.bf16.mxu0 %v2901_v9 }
  0xe2   :  { %2713 = vmatprep.subr.bf16.mxu1 %v2902_v10 }
  0xe3   :  { %2702 = vmatpush3.bf16.msra.mxu0 %v2901_v9 }
  0xe4   :  { %2714 = vmatpush3.bf16.msra.mxu1 %v2902_v10  ;;  %2703 = vmatprep.subr.bf16.mxu0 %v2903_v11 }
  0xe5   :  { %2715 = vmatprep.subr.bf16.mxu1 %v2904_v12 }
  0xe7   :  { %2704 = vmatpush3.bf16.msra.mxu0 %v2903_v11 }
  0xe8   :  { %2716 = vmatpush3.bf16.msra.mxu1 %v2904_v12  ;;  %2705 = vmatprep.subr.bf16.mxu0 %v2905_v13 }
  0xe9   :  { %2717 = vmatprep.subr.bf16.mxu1 %v2906_v14 }
  0xeb   :  { %2706 = vmatpush3.bf16.msra.mxu0 %v2905_v13 }
  0xec   :  { %2718 = vmatpush3.bf16.msra.mxu1 %v2906_v14  ;;  %2723 = vmatprep.subr.bf16.mxu0 %v2907_v15 }
  0xed   :  { %2735 = vmatprep.subr.bf16.mxu1 %v2908_v16 }
  0xee   :  { %2708 = vmatmul.mubr.msk.bf16.vlgmr.msra.gmra.mrb[16].mxu0 %vm40_vm0, %v3181_v47 }
  0xef   :  { %2720 = vmatmul.mubr.msk.bf16.vlgmr.msra.gmra.mrb[16].mxu1 %vm40_vm0, %v3181_v47  ;;  %2724 = vmatpush3.bf16.msra.mxu0 %v2907_v15 }
  0xf0   :  { %2731 = vmatprep.mubr.msk.bf16.mxu0 %vm40_vm0, %v3183_v48  ;;  %2736 = vmatpush3.bf16.msra.mxu1 %v2908_v16 }
  0xf1   :  { %2743 = vmatprep.mubr.msk.bf16.mxu1 %vm40_vm0, %v3183_v48  ;;  %2725 = vmatprep.subr.bf16.mxu0 %v2909_v17 }
  0xf2   :  { %2737 = vmatprep.subr.bf16.mxu1 %v2910_v18 }
  0xf3   :  { %2726 = vmatpush3.bf16.msra.mxu0 %v2909_v17 }
  0xf4   :  { %2738 = vmatpush3.bf16.msra.mxu1 %v2910_v18  ;;  %2727 = vmatprep.subr.bf16.mxu0 %v2911_v19 }
  0xf5   :  { %2739 = vmatprep.subr.bf16.mxu1 %v2912_v20 }
  0xf7   :  { %2728 = vmatpush3.bf16.msra.mxu0 %v2911_v19 }
  0xf8   :  { %2740 = vmatpush3.bf16.msra.mxu1 %v2912_v20  ;;  %2729 = vmatprep.subr.bf16.mxu0 %v2913_v21 }
  0xf9   :  { %2741 = vmatprep.subr.bf16.mxu1 %v2914_v22 }
  0xfb   :  { %2730 = vmatpush3.bf16.msra.mxu0 %v2913_v21 }
  0xfc   :  { %2742 = vmatpush3.bf16.msra.mxu1 %v2914_v22 }
  0xfe   :  { %2732 = vmatmul.mubr.msk.bf16.vlgmr.msra.gmra.mrb[20].mxu0 %vm40_vm0, %v3181_v47 }
  0xff   :  { %2744 = vmatmul.mubr.msk.bf16.vlgmr.msra.gmra.mrb[20].mxu1 %vm40_vm0, %v3181_v47 }
 0x181   :  { %v3347_v23 = vpop.f32.mrb[0].mxu0  ;;  %v3349_v24 = vpop.f32.mrb[0].mxu1 }
 0x182   :  { %v242_v25 = vpop.f32.mrb[1].mxu0  ;;  %v315_v26 = vpop.f32.mrb[1].mxu1 }
 0x183   :  { %v2614_v27 = vpop.f32.mrb[2].mxu0  ;;  %v3351_v28 = vpop.f32.mrb[2].mxu1 }
 0x184   :  { %v1061_v29 = vpack.c.bf16 %v2614_v27, %v3347_v23  ;;  %v1063_v30 = vpack.c.bf16 %v3351_v28, %v3349_v24  ;;  %v245_v31 = vpop.f32.mrb[3].mxu0  ;;  %v318_v32 = vpop.f32.mrb[3].mxu1 }
 0x185   :  { %v1060_v33 = vpack.c.bf16 %v245_v31, %v242_v25  ;;  %v1062_v34 = vpack.c.bf16 %v318_v32, %v315_v26 }
 0x187   :  { %2751 = vmatprep.mubr.msk.bf16.mxu0 %vm1080_vm1, %v1060_v33  ;;  %2759 = vmatprep.mubr.msk.bf16.mxu1 %vm1080_vm1, %v1062_v34 }
 0x191   :  { %v3358_v35 = vpop.f32.mrb[4].mxu0  ;;  %v3360_v36 = vpop.f32.mrb[4].mxu1 }
 0x192   :  { %v388_v37 = vpop.f32.mrb[5].mxu0  ;;  %v461_v38 = vpop.f32.mrb[5].mxu1 }
 0x193   :  { %v3362_v39 = vpop.f32.mrb[6].mxu0  ;;  %v3364_v40 = vpop.f32.mrb[6].mxu1 }
 0x194   :  { %v1065_v41 = vpack.c.bf16 %v3362_v39, %v3358_v35  ;;  %v1067_v42 = vpack.c.bf16 %v3364_v40, %v3360_v36  ;;  %v391_v43 = vpop.f32.mrb[7].mxu0  ;;  %v464_v44 = vpop.f32.mrb[7].mxu1  ;;  %v1078_v39 = vld [vmem:[%s3740_s1 + $0x10] sm:$0xff] }
 0x195   :  { %v1064_v45 = vpack.c.bf16 %v391_v43, %v388_v37  ;;  %v1066_v46 = vpack.c.bf16 %v464_v44, %v461_v38 }
 0x1a1   :  { %v2661_v47 = vpop.f32.mrb[8].mxu0 }
 0x1a2   :  { %v2673_v48 = vpop.f32.mrb[8].mxu1  ;;  %v534_v49 = vpop.f32.mrb[9].mxu0 }
 0x1a3   :  { %v607_v50 = vpop.f32.mrb[9].mxu1  ;;  %v2662_v51 = vpop.f32.mrb[10].mxu0 }
 0x1a4   :  { %v1069_v52 = vpack.c.bf16 %v2662_v51, %v2661_v47  ;;  %v2674_v53 = vpop.f32.mrb[10].mxu1  ;;  %v537_v54 = vpop.f32.mrb[11].mxu0 }
 0x1a5   :  { %v1071_v55 = vpack.c.bf16 %v2674_v53, %v2673_v48  ;;  %v1068_v56 = vpack.c.bf16 %v537_v54, %v534_v49  ;;  %v610_v57 = vpop.f32.mrb[11].mxu1 }
 0x1a6   :  { %v1070_v58 = vpack.c.bf16 %v610_v57, %v607_v50  ;;  %v1091_v61 = vsel %vm1080_vm1, %v1069_v52, 0 }
 0x1a7   :  { %v1088_v59 = vsel %vm1080_vm1, %v1068_v56, 0  ;;  %2855 = vmatprep.subr.msk.bf16.mxu0 %vm1080_vm1, %v1068_v56  ;;  %v1152_v62 = vsel %vm1080_vm1, %v1071_v55, 0  ;;  %v1077_v56 = vld [vmem:[%s3740_s1 + $0x8] sm:$0xff] }
 0x1a8   :  { %v1149_v60 = vsel %vm1080_vm1, %v1070_v58, 0  ;;  %2857 = vmatprep.subr.msk.bf16.mxu1 %vm1080_vm1, %v1070_v58  ;;  %2748 = vmatpush3.bf16.xpose.msra.mxu0 %v1088_v59 }
 0x1a9   :  { %2756 = vmatpush3.bf16.xpose.msra.mxu1 %v1149_v60  ;;  %2856 = vmatprep.subr.msk.bf16.mxu0 %vm1080_vm1, %v1069_v52  ;;  %v1076_v52 = vld [vmem:[%s3740_s1] sm:$0xff] }
 0x1aa   :  { %2858 = vmatprep.subr.msk.bf16.mxu1 %vm1080_vm1, %v1071_v55 }
 0x1b0   :  { %2750 = vmatpush3.bf16.xpose.msra.mxu0 %v1091_v61 }
 0x1b1   :  { %2758 = vmatpush3.bf16.xpose.msra.mxu1 %v1152_v62  ;;  %v2685_v63 = vpop.f32.mrb[12].mxu0 }
 0x1b2   :  { %v2697_v0 = vpop.f32.mrb[12].mxu1  ;;  %v680_v1 = vpop.f32.mrb[13].mxu0 }
 0x1b3   :  { %v753_v2 = vpop.f32.mrb[13].mxu1  ;;  %v2686_v3 = vpop.f32.mrb[14].mxu0 }
 0x1b4   :  { %v1073_v4 = vpack.c.bf16 %v2686_v3, %v2685_v63  ;;  %v2698_v5 = vpop.f32.mrb[14].mxu1  ;;  %v683_v6 = vpop.f32.mrb[15].mxu0 }
 0x1b5   :  { %v1075_v7 = vpack.c.bf16 %v2698_v5, %v2697_v0  ;;  %v1072_v8 = vpack.c.bf16 %v683_v6, %v680_v1  ;;  %v756_v9 = vpop.f32.mrb[15].mxu1 }
 0x1b6   :  { %v1074_v10 = vpack.c.bf16 %v756_v9, %v753_v2  ;;  %v1213_v13 = vsel %vm1080_vm1, %v1073_v4, 0 }
 0x1b7   :  { %v1210_v11 = vsel %vm1080_vm1, %v1072_v8, 0  ;;  %2752 = vmatmul.mubr.msk.bf16.vlgmr.msra.gmra.mrb[24].mxu0 %vm1080_vm1, %v1061_v29  ;;  %2859 = vmatprep.subr.msk.bf16.mxu0 %vm1080_vm1, %v1072_v8  ;;  %v1274_v14 = vsel %vm1080_vm1, %v1075_v7, 0 }
 0x1b8   :  { %v1271_v12 = vsel %vm1080_vm1, %v1074_v10, 0  ;;  %2760 = vmatmul.mubr.msk.bf16.vlgmr.msra.gmra.mrb[24].mxu1 %vm1080_vm1, %v1063_v30  ;;  %2861 = vmatprep.subr.msk.bf16.mxu1 %vm1080_vm1, %v1074_v10 }
 0x1b9   :  { %2764 = vmatpush3.bf16.xpose.msra.mxu0 %v1210_v11  ;;  %2767 = vmatprep.mubr.msk.bf16.mxu0 %vm1080_vm1, %v1064_v45 }
 0x1ba   :  { %2772 = vmatpush3.bf16.xpose.msra.mxu1 %v1271_v12  ;;  %2775 = vmatprep.mubr.msk.bf16.mxu1 %vm1080_vm1, %v1066_v46 }
 0x1bb   :  { %2860 = vmatprep.subr.msk.bf16.mxu0 %vm1080_vm1, %v1073_v4  ;;  %2862 = vmatprep.subr.msk.bf16.mxu1 %vm1080_vm1, %v1075_v7 }
 0x1c1   :  { %2766 = vmatpush3.bf16.xpose.msra.mxu0 %v1213_v13  ;;  %v2709_v15 = vpop.f32.mrb[16].mxu0 }
 0x1c2   :  { %2774 = vmatpush3.bf16.xpose.msra.mxu1 %v1274_v14  ;;  %v2721_v16 = vpop.f32.mrb[16].mxu1  ;;  %v826_v17 = vpop.f32.mrb[17].mxu0 }
 0x1c3   :  { %v899_v18 = vpop.f32.mrb[17].mxu1  ;;  %v2710_v19 = vpop.f32.mrb[18].mxu0 }
 0x1c4   :  { %v1511_v20 = vpack.c.bf16 %v2710_v19, %v2709_v15  ;;  %v2722_v21 = vpop.f32.mrb[18].mxu1  ;;  %v829_v22 = vpop.f32.mrb[19].mxu0 }
 0x1c5   :  { %v1513_v23 = vpack.c.bf16 %v2722_v21, %v2721_v16  ;;  %v1510_v24 = vpack.c.bf16 %v829_v22, %v826_v17  ;;  %v902_v25 = vpop.f32.mrb[19].mxu1 }
 0x1c6   :  { %v1512_v26 = vpack.c.bf16 %v902_v25, %v899_v18 }
 0x1c7   :  { %2779 = vmatprep.subr.bf16.mxu0 %v1510_v24 }
 0x1c8   :  { %2768 = vmatmul.mubr.msk.bf16.vlgmr.msra.gmra.mrb[28].mxu0 %vm1080_vm1, %v1065_v41  ;;  %2787 = vmatprep.subr.bf16.mxu1 %v1512_v26  ;;  %v1079_v41 = vld [vmem:[%s3740_s1 + $0x18] sm:$0xff] }
 0x1c9   :  { %2776 = vmatmul.mubr.msk.bf16.vlgmr.msra.gmra.mrb[28].mxu1 %vm1080_vm1, %v1067_v42  ;;  %2780 = vmatpush3.bf16.msra.mxu0 %v1510_v24 }
 0x1ca   :  { %2788 = vmatpush3.bf16.msra.mxu1 %v1512_v26  ;;  %2781 = vmatprep.subr.bf16.mxu0 %v1511_v20 }
 0x1cb   :  { %2789 = vmatprep.subr.bf16.mxu1 %v1513_v23 }
 0x1cd   :  { %2782 = vmatpush3.bf16.msra.mxu0 %v1511_v20 }
 0x1ce   :  { %2790 = vmatpush3.bf16.msra.mxu1 %v1513_v23 }
 0x1d1   :  { %v2733_v27 = vpop.f32.mrb[20].mxu0 }
 0x1d2   :  { %v2745_v28 = vpop.f32.mrb[20].mxu1  ;;  %v972_v29 = vpop.f32.mrb[21].mxu0 }
 0x1d3   :  { %v1045_v30 = vpop.f32.mrb[21].mxu1  ;;  %v2734_v31 = vpop.f32.mrb[22].mxu0 }
 0x1d4   :  { %v3398_v32 = vpack.c.bf16 %v2734_v31, %v2733_v27  ;;  %v2746_v33 = vpop.f32.mrb[22].mxu1  ;;  %v975_v34 = vpop.f32.mrb[23].mxu0 }
 0x1d5   :  { %v3400_v35 = vpack.c.bf16 %v2746_v33, %v2745_v28  ;;  %v3402_v36 = vpack.c.bf16 %v975_v34, %v972_v29  ;;  %v1048_v37 = vpop.f32.mrb[23].mxu1 }
 0x1d6   :  { %v3404_v38 = vpack.c.bf16 %v1048_v37, %v1045_v30 }
 0x1d7   :  { %2795 = vmatprep.subr.bf16.mxu0 %v3402_v36 }
 0x1d8   :  { %2803 = vmatprep.subr.bf16.mxu1 %v3404_v38 }
 0x28a   :  { %v2753_v40 = vpop.f32.mrb[24].mxu0 }
 0x28b   :  { %v3414_v42 = vadd.f32 %v2753_v40, %v1078_v39  ;;  %v2761_v43 = vpop.f32.mrb[24].mxu1  ;;  %v1127_v44 = vpop.f32.mrb[25].mxu0 }
 0x28c   :  { %v1188_v45 = vpop.f32.mrb[25].mxu1  ;;  %v2754_v46 = vpop.f32.mrb[26].mxu0  ;;  %v3416_v47 = vadd.f32 %v2761_v43, %v1078_v39  ;;  %v3432_v57 = vadd.f32 %v1127_v44, %v1076_v52 }
 0x28d   :  { %v3418_v48 = vadd.f32 %v2754_v46, %v1079_v41  ;;  %v2762_v49 = vpop.f32.mrb[26].mxu1  ;;  %v1130_v50 = vpop.f32.mrb[27].mxu0  ;;  %v1332_v51 = vsel %vm1325_vm2, %v3414_v42, -inf  ;;  %v3440_v61 = vadd.f32 %v1188_v45, %v1076_v52 }
 0x28e   :  { %v1191_v53 = vpop.f32.mrb[27].mxu1  ;;  %1333 = vmax.xlane.f32.xlu0 %v1332_v51  ;;  %v3425_v54 = vadd.f32 %v2762_v49, %v1079_v41  ;;  %v1344_v58 = vsel %vm1325_vm2, %v3416_v47, -inf  ;;  %v3436_v59 = vadd.f32 %v1130_v50, %v1077_v56  ;;  %v1326_v62 = vsel %vm1325_vm2, %v3432_v57, -inf }
 0x28f   :  { %v1335_v55 = vsel %vm1325_vm2, %v3418_v48, -inf  ;;  %v3444_v63 = vadd.f32 %v1191_v53, %v1077_v56  ;;  %v1338_v1 = vsel %vm1325_vm2, %v3440_v61, -inf }
 0x290   :  { %1336 = vmax.xlane.f32.xlu1 %v1335_v55  ;;  %v1347_v60 = vsel %vm1325_vm2, %v3425_v54, -inf  ;;  %v1329_v0 = vsel %vm1325_vm2, %v3436_v59, -inf }
 0x291   :  { %v1341_v3 = vsel %vm1325_vm2, %v3444_v63, -inf }
 0x292   :  { %1345 = vmax.xlane.f32.xlu0 %v1344_v58 }
 0x294   :  { %1348 = vmax.xlane.f32.xlu1 %v1347_v60 }
 0x296   :  { %1327 = vmax.xlane.f32.xlu0 %v1326_v62 }
 0x298   :  { %1330 = vmax.xlane.f32.xlu1 %v1329_v0 }
 0x29a   :  { %1339 = vmax.xlane.f32.xlu0 %v1338_v1 }
 0x29b   :  { %v2769_v2 = vpop.f32.mrb[28].mxu0 }
 0x29c   :  { %v3452_v4 = vadd.f32 %v2769_v2, %v1078_v39  ;;  %v2777_v5 = vpop.f32.mrb[28].mxu1  ;;  %v1249_v6 = vpop.f32.mrb[29].mxu0  ;;  %1342 = vmax.xlane.f32.xlu1 %v1341_v3 }
 0x29d   :  { %v1310_v7 = vpop.f32.mrb[29].mxu1  ;;  %v2770_v8 = vpop.f32.mrb[30].mxu0  ;;  %v3454_v9 = vadd.f32 %v1249_v6, %v1076_v52  ;;  %v3472_v21 = vadd.f32 %v2777_v5, %v1078_v39 }
 0x29e   :  { %v3456_v10 = vadd.f32 %v2770_v8, %v1079_v41  ;;  %v2778_v11 = vpop.f32.mrb[30].mxu1  ;;  %v1252_v12 = vpop.f32.mrb[31].mxu0  ;;  %v1356_v13 = vsel %vm1325_vm2, %v3452_v4, -inf  ;;  %v3464_v17 = vadd.f32 %v1310_v7, %v1076_v52 }
 0x29f   :  { %v1313_v14 = vpop.f32.mrb[31].mxu1  ;;  %1357 = vmax.xlane.f32.xlu0 %v1356_v13  ;;  %v3460_v15 = vadd.f32 %v1252_v12, %v1077_v56  ;;  %v1350_v18 = vsel %vm1325_vm2, %v3454_v9, -inf  ;;  %v3476_v23 = vadd.f32 %v2778_v11, %v1079_v41  ;;  %v1368_v25 = vsel %vm1325_vm2, %v3472_v21, -inf }
 0x2a0   :  { %v1359_v16 = vsel %vm1325_vm2, %v3456_v10, -inf  ;;  %v3468_v19 = vadd.f32 %v1313_v14, %v1077_v56  ;;  %v1362_v22 = vsel %vm1325_vm2, %v3464_v17, -inf }
 0x2a1   :  { %1360 = vmax.xlane.f32.xlu1 %v1359_v16  ;;  %v1353_v20 = vsel %vm1325_vm2, %v3460_v15, -inf  ;;  %v1371_v26 = vsel %vm1325_vm2, %v3476_v23, -inf }
 0x2a2   :  { %v1365_v24 = vsel %vm1325_vm2, %v3468_v19, -inf }
 0x2a3   :  { %1351 = vmax.xlane.f32.xlu0 %v1350_v18 }
 0x2a5   :  { %1354 = vmax.xlane.f32.xlu1 %v1353_v20 }
 0x2a7   :  { %1363 = vmax.xlane.f32.xlu0 %v1362_v22 }
 0x2a9   :  { %1366 = vmax.xlane.f32.xlu1 %v1365_v24 }
 0x2ab   :  { %1369 = vmax.xlane.f32.xlu0 %v1368_v25 }
 0x2ad   :  { %1372 = vmax.xlane.f32.xlu1 %v1371_v26 }
 0x31b   :  { %v1334_v27 = vpop.xlane.xlu0 %1333 }
 0x31c   :  { %v1376_v28 = vsub.f32 %v3414_v42, %v1334_v27 }
 0x31d   :  { %v1337_v29 = vpop.xlane.xlu1 %1336 }
 0x31e   :  { %v1394_v30 = vmul.f32 1.442695, %v1376_v28  ;;  %v1377_v31 = vsub.f32 %v3418_v48, %v1337_v29 }
 0x31f   :  { %v1346_v33 = vpop.xlane.xlu0 %1345 }
 0x320   :  { %2947 = vpow2.f32 %v1394_v30  ;;  %v1396_v34 = vmul.f32 1.442695, %v1377_v31  ;;  %v1380_v37 = vsub.f32 %v3416_v47, %v1346_v33 }
 0x321   :  { %v1349_v39 = vpop.xlane.xlu1 %1348 }
 0x322   :  { %2949 = vpow2.f32 %v1396_v34  ;;  %v1402_v40 = vmul.f32 1.442695, %v1380_v37  ;;  %v1381_v41 = vsub.f32 %v3425_v54, %v1349_v39 }
 0x323   :  { %v1328_v43 = vpop.xlane.xlu0 %1327 }
 0x324   :  { %2951 = vpow2.f32 %v1402_v40  ;;  %v1404_v44 = vmul.f32 1.442695, %v1381_v41  ;;  %v1374_v45 = vsub.f32 %v3432_v57, %v1328_v43 }
 0x325   :  { %v1331_v42 = vpop.xlane.xlu1 %1330 }
 0x326   :  { %2953 = vpow2.f32 %v1404_v44  ;;  %v1390_v46 = vmul.f32 1.442695, %v1374_v45  ;;  %v1375_v48 = vsub.f32 %v3436_v59, %v1331_v42 }
 0x327   :  { %v1340_v49 = vpop.xlane.xlu0 %1339 }
 0x328   :  { %2955 = vpow2.f32 %v1390_v46  ;;  %v1392_v50 = vmul.f32 1.442695, %v1375_v48  ;;  %v1378_v47 = vsub.f32 %v3440_v61, %v1340_v49 }
 0x329   :  { %v1343_v51 = vpop.xlane.xlu1 %1342 }
 0x32a   :  { %v3491_v52 = vpop.eup %2947  ;;  %2957 = vpow2.f32 %v1392_v50  ;;  %v1398_v53 = vmul.f32 1.442695, %v1378_v47  ;;  %v1379_v54 = vsub.f32 %v3444_v63, %v1343_v51 }
 0x32b   :  { %v1428_v55 = vsel %vm1325_vm2, %v3491_v52, 0.0 }
 0x32c   :  { %v3496_v56 = vpop.eup %2949  ;;  %2959 = vpow2.f32 %v1398_v53  ;;  %v1400_v57 = vmul.f32 1.442695, %v1379_v54  ;;  %v1358_v58 = vpop.xlane.xlu0 %1357  ;;  %1429 = vadd.xlane.f32.xlu0 %v1428_v55 }
 0x32d   :  { %v1384_v59 = vsub.f32 %v3452_v4, %v1358_v58  ;;  %v1431_v60 = vsel %vm1325_vm2, %v3496_v56, 0.0 }
 0x32e   :  { %v3501_v61 = vpop.eup %2951  ;;  %2961 = vpow2.f32 %v1400_v57  ;;  %v1361_v62 = vpop.xlane.xlu1 %1360  ;;  %1432 = vadd.xlane.f32.xlu1 %v1431_v60 }
 0x32f   :  { %v1410_v63 = vmul.f32 1.442695, %v1384_v59  ;;  %v1385_v0 = vsub.f32 %v3456_v10, %v1361_v62  ;;  %v1440_v1 = vsel %vm1325_vm2, %v3501_v61, 0.0 }
 0x330   :  { %v3506_v2 = vpop.eup %2953  ;;  %v1352_v3 = vpop.xlane.xlu0 %1351  ;;  %1441 = vadd.xlane.f32.xlu0 %v1440_v1 }
 0x331   :  { %2963 = vpow2.f32 %v1410_v63  ;;  %v1412_v4 = vmul.f32 1.442695, %v1385_v0  ;;  %v1382_v5 = vsub.f32 %v3454_v9, %v1352_v3  ;;  %v1443_v6 = vsel %vm1325_vm2, %v3506_v2, 0.0 }
 0x332   :  { %v3511_v7 = vpop.eup %2955  ;;  %v1355_v8 = vpop.xlane.xlu1 %1354  ;;  %1444 = vadd.xlane.f32.xlu1 %v1443_v6 }
 0x333   :  { %2965 = vpow2.f32 %v1412_v4  ;;  %v1406_v10 = vmul.f32 1.442695, %v1382_v5  ;;  %v1383_v11 = vsub.f32 %v3460_v15, %v1355_v8  ;;  %v1422_v12 = vsel %vm1325_vm2, %v3511_v7, 0.0 }
 0x334   :  { %v3516_v13 = vpop.eup %2957  ;;  %v1364_v14 = vpop.xlane.xlu0 %1363  ;;  %1423 = vadd.xlane.f32.xlu0 %v1422_v12 }
 0x335   :  { %2967 = vpow2.f32 %v1406_v10  ;;  %v1408_v9 = vmul.f32 1.442695, %v1383_v11  ;;  %v1386_v16 = vsub.f32 %v3464_v17, %v1364_v14  ;;  %v1425_v18 = vsel %vm1325_vm2, %v3516_v13, 0.0 }
 0x336   :  { %v3521_v20 = vpop.eup %2959  ;;  %v1367_v22 = vpop.xlane.xlu1 %1366  ;;  %1426 = vadd.xlane.f32.xlu1 %v1425_v18 }
 0x337   :  { %2969 = vpow2.f32 %v1408_v9  ;;  %v1414_v15 = vmul.f32 1.442695, %v1386_v16  ;;  %v1387_v24 = vsub.f32 %v3468_v19, %v1367_v22  ;;  %v1434_v25 = vsel %vm1325_vm2, %v3521_v20, 0.0 }
 0x338   :  { %v3526_v26 = vpop.eup %2961  ;;  %v1370_v27 = vpop.xlane.xlu0 %1369  ;;  %1435 = vadd.xlane.f32.xlu0 %v1434_v25 }
 0x339   :  { %2971 = vpow2.f32 %v1414_v15  ;;  %v1416_v17 = vmul.f32 1.442695, %v1387_v24  ;;  %v1388_v28 = vsub.f32 %v3472_v21, %v1370_v27  ;;  %v1437_v29 = vsel %vm1325_vm2, %v3526_v26, 0.0 }
 0x33a   :  { %v1373_v30 = vpop.xlane.xlu1 %1372  ;;  %1438 = vadd.xlane.f32.xlu1 %v1437_v29 }
 0x33b   :  { %v3531_v31 = vpop.eup %2963  ;;  %2973 = vpow2.f32 %v1416_v17  ;;  %v1418_v19 = vmul.f32 1.442695, %v1388_v28  ;;  %v1389_v33 = vsub.f32 %v3476_v23, %v1373_v30 }
 0x33c   :  { %v1452_v34 = vsel %vm1325_vm2, %v3531_v31, 0.0 }
 0x33d   :  { %v3536_v37 = vpop.eup %2965  ;;  %2975 = vpow2.f32 %v1418_v19  ;;  %v1420_v39 = vmul.f32 1.442695, %v1389_v33  ;;  %1453 = vadd.xlane.f32.xlu0 %v1452_v34 }
 0x33e   :  { %v1455_v21 = vsel %vm1325_vm2, %v3536_v37, 0.0 }
 0x33f   :  { %v3540_v40 = vpop.eup %2967  ;;  %2977 = vpow2.f32 %v1420_v39  ;;  %1456 = vadd.xlane.f32.xlu1 %v1455_v21 }
 0x340   :  { %v1446_v41 = vsel %vm1325_vm2, %v3540_v40, 0.0 }
 0x341   :  { %v3544_v43 = vpop.eup %2969  ;;  %1447 = vadd.xlane.f32.xlu0 %v1446_v41 }
 0x342   :  { %v1449_v23 = vsel %vm1325_vm2, %v3544_v43, 0.0 }
 0x343   :  { %v3548_v44 = vpop.eup %2971  ;;  %1450 = vadd.xlane.f32.xlu1 %v1449_v23 }
 0x344   :  { %v1458_v45 = vsel %vm1325_vm2, %v3548_v44, 0.0 }
 0x345   :  { %v3552_v42 = vpop.eup %2973  ;;  %1459 = vadd.xlane.f32.xlu0 %v1458_v45  ;;  %v2916_v45 = vld [vmem:[%s3742_s3 + $0x8] sm:$0xff]  }
 0x346   :  { %v1461_v46 = vsel %vm1325_vm2, %v3552_v42, 0.0 }
 0x347   :  { %v3556_v48 = vpop.eup %2975  ;;  %1462 = vadd.xlane.f32.xlu1 %v1461_v46  ;;  %v2918_v46 = vld [vmem:[%s3742_s3 + $0x18] sm:$0xff]  }
 0x348   :  { %v1464_v49 = vsel %vm1325_vm2, %v3556_v48, 0.0 }
 0x349   :  { %v3560_v50 = vpop.eup %2977  ;;  %1465 = vadd.xlane.f32.xlu0 %v1464_v49 }
 0x34a   :  { %v1467_v47 = vsel %vm1325_vm2, %v3560_v50, 0.0 }
 0x34b   :  { %1468 = vadd.xlane.f32.xlu1 %v1467_v47 }
 0x3b9   :  { %v1430_v51 = vpop.xlane.xlu0 %1429 }
 0x3bb   :  { %v1433_v53 = vpop.xlane.xlu1 %1432 }
 0x3bc   :  { %2979 = vrcp.f32 %v1433_v53 }
 0x3bd   :  { %v1442_v54 = vpop.xlane.xlu0 %1441 }
 0x3bf   :  { %v1445_v55 = vpop.xlane.xlu1 %1444 }
 0x3c1   :  { %v1424_v57 = vpop.xlane.xlu0 %1423 }
 0x3c2   :  { %2981 = vrcp.f32 %v1424_v57 }
 0x3c3   :  { %2983 = vrcp.f32 %v1430_v51  ;;  %v1427_v58 = vpop.xlane.xlu1 %1426 }
 0x3c4   :  { %2985 = vrcp.f32 %v1427_v58 }
 0x3c5   :  { %2987 = vrcp.f32 %v1445_v55  ;;  %v1436_v59 = vpop.xlane.xlu0 %1435 }
 0x3c6   :  { %2989 = vrcp.f32 %v1436_v59  ;;  %v2980_v63 = vpop.eup %2979 }
 0x3c7   :  { %2991 = vrcp.f32 %v1442_v54  ;;  %v1439_v60 = vpop.xlane.xlu1 %1438  ;;  %v1489_v5 = vmul.f32 %v2980_v63, %v3496_v56 }
 0x3c8   :  { %2993 = vrcp.f32 %v1439_v60 }
 0x3ca   :  { %v1454_v62 = vpop.xlane.xlu0 %1453 }
 0x3cc   :  { %v2982_v0 = vpop.eup %2981  ;;  %v1457_v1 = vpop.xlane.xlu1 %1456 }
 0x3cd   :  { %v2984_v3 = vpop.eup %2983  ;;  %2995 = vrcp.f32 %v1457_v1  ;;  %v1486_v10 = vmul.f32 %v2982_v0, %v3511_v7 }
 0x3ce   :  { %v2986_v4 = vpop.eup %2985  ;;  %v1448_v6 = vpop.xlane.xlu0 %1447  ;;  %v1488_v14 = vmul.f32 %v2984_v3, %v3491_v52 }
 0x3cf   :  { %v2988_v8 = vpop.eup %2987  ;;  %2997 = vrcp.f32 %v1448_v6  ;;  %v1487_v11 = vmul.f32 %v2986_v4, %v3516_v13 }
 0x3d0   :  { %v2990_v12 = vpop.eup %2989  ;;  %2999 = vrcp.f32 %v1454_v62  ;;  %v1451_v9 = vpop.xlane.xlu1 %1450  ;;  %v1493_v15 = vmul.f32 %v2988_v8, %v3506_v2  ;;  %v1503_v24 = vpack.c.bf16 %v1489_v5, %v1488_v14 }
 0x3d1   :  { %v2992_v16 = vpop.eup %2991  ;;  %3001 = vrcp.f32 %v1451_v9  ;;  %v1502_v18 = vpack.c.bf16 %v1487_v11, %v1486_v10  ;;  %v1490_v7 = vmul.f32 %v2990_v12, %v3521_v20 }
 0x3d2   :  { %v2994_v22 = vpop.eup %2993  ;;  %v1460_v56 = vpop.xlane.xlu0 %1459  ;;  %v1492_v25 = vmul.f32 %v2992_v16, %v3501_v61 }
 0x3d3   :  { %3003 = vrcp.f32 %v1460_v56  ;;  %2783 = vmatprep.mubr.msk.bf16.mxu0 %vm1325_vm2, %v1502_v18  ;;  %v1491_v13 = vmul.f32 %v2994_v22, %v3526_v26 }
 0x3d4   :  { %v1463_v52 = vpop.xlane.xlu1 %1462  ;;  %2784 = vmatmul.mubr.msk.bf16.vlgmr.msra.gmra.mrb[32].mxu0 %vm1325_vm2, %v1503_v24  ;;  %v1505_v17 = vpack.c.bf16 %v1493_v15, %v1492_v25 }
 0x3d5   :  { %3005 = vrcp.f32 %v1463_v52  ;;  %2796 = vmatpush3.bf16.msra.mxu0 %v3402_v36  ;;  %v1504_v27 = vpack.c.bf16 %v1491_v13, %v1490_v7 }
 0x3d6   :  { %2797 = vmatprep.subr.bf16.mxu0 %v3398_v32  ;;  %v1466_v2 = vpop.xlane.xlu0 %1465 }
 0x3d7   :  { %3007 = vrcp.f32 %v1466_v2  ;;  %2791 = vmatprep.mubr.msk.bf16.mxu1 %vm1325_vm2, %v1504_v27  ;;  %v2996_v28 = vpop.eup %2995 }
 0x3d8   :  { %v1469_v20 = vpop.xlane.xlu1 %1468  ;;  %2792 = vmatmul.mubr.msk.bf16.vlgmr.msra.gmra.mrb[32].mxu1 %vm1325_vm2, %v1505_v17  ;;  %v1497_v29 = vmul.f32 %v2996_v28, %v3536_v37 }
 0x3d9   :  { %v2998_v26 = vpop.eup %2997  ;;  %3009 = vrcp.f32 %v1469_v20  ;;  %2798 = vmatpush3.bf16.msra.mxu0 %v3398_v32  ;;  %2804 = vmatpush3.bf16.msra.mxu1 %v3404_v38 }
 0x3da   :  { %v3000_v61 = vpop.eup %2999  ;;  %2805 = vmatprep.subr.bf16.mxu1 %v3400_v35  ;;  %v1494_v30 = vmul.f32 %v2998_v26, %v3540_v40 }
 0x3db   :  { %v3002_v36 = vpop.eup %3001  ;;  %v1496_v34 = vmul.f32 %v3000_v61, %v3531_v31 }
 0x3dc   :  { %v1495_v19 = vmul.f32 %v3002_v36, %v3544_v43 }
 0x3dd   :  { %v3004_v33 = vpop.eup %3003  ;;  %2806 = vmatpush3.bf16.msra.mxu1 %v3400_v35  ;;  %v1507_v32 = vpack.c.bf16 %v1497_v29, %v1496_v34 }
 0x3de   :  { %v1506_v39 = vpack.c.bf16 %v1495_v19, %v1494_v30  ;;  %v1498_v38 = vmul.f32 %v3004_v33, %v3548_v44  ;;  %v2915_v44 = vld [vmem:[%s3742_s3] sm:$0xff]   ;;  %2817 = vmatprep.subr.bf16.mxu1 %v2916_v45 }
 0x3df   :  { %v3006_v21 = vpop.eup %3005  ;;  %2811 = vmatprep.subr.bf16.mxu0 %v2915_v44 }
 0x3e0   :  { %2799 = vmatprep.mubr.msk.bf16.mxu0 %vm1325_vm2, %v1506_v39  ;;  %v1499_v41 = vmul.f32 %v3006_v21, %v3552_v42  ;;  %v2917_v42 = vld [vmem:[%s3742_s3 + $0x10] sm:$0xff]  }
 0x3e1   :  { %v3008_v23 = vpop.eup %3007  ;;  %2800 = vmatmul.mubr.msk.bf16.vlgmr.msra.gmra.mrb[36].mxu0 %vm1325_vm2, %v1507_v32 }
 0x3e2   :  { %v1508_v37 = vpack.c.bf16 %v1499_v41, %v1498_v38  ;;  %v1500_v43 = vmul.f32 %v3008_v23, %v3556_v48  ;;  %2812 = vmatpush3.bf16.msra.mxu0 %v2915_v44 }
 0x3e3   :  { %v3010_v40 = vpop.eup %3009  ;;  %2823 = vmatprep.subr.bf16.mxu0 %v2917_v42 }
 0x3e4   :  { %v1501_v31 = vmul.f32 %v3010_v40, %v3560_v50  ;;  %2807 = vmatprep.mubr.msk.bf16.mxu1 %vm1325_vm2, %v1508_v37 }
 0x3e6   :  { %v1509_v35 = vpack.c.bf16 %v1501_v31, %v1500_v43 }
 0x3e8   :  { %2808 = vmatmul.mubr.msk.bf16.vlgmr.msra.gmra.mrb[36].mxu1 %vm1325_vm2, %v1509_v35 }
 0x3e9   :  { %2818 = vmatpush3.bf16.msra.mxu1 %v2916_v45 }
 0x3ea   :  { %2829 = vmatprep.subr.bf16.mxu1 %v2918_v46 }
 0x4a7   :  { %v2785_v48 = vpop.f32.mrb[32].mxu0 }
 0x4a8   :  { %v1558_v49 = vpop.f32.mrb[33].mxu0 }
 0x4a9   :  { %v2786_v50 = vpop.f32.mrb[34].mxu0 }
 0x4aa   :  { %v1739_v47 = vpack.c.bf16 %v2786_v50, %v2785_v48  ;;  %v1561_v51 = vpop.f32.mrb[35].mxu0 }
 0x4ab   :  { %v1738_v53 = vpack.c.bf16 %v1561_v51, %v1558_v49  ;;  %v2793_v54 = vpop.f32.mrb[32].mxu1 }
 0x4ac   :  { %v1613_v55 = vpop.f32.mrb[33].mxu1 }
 0x4ad   :  { %v2794_v57 = vpop.f32.mrb[34].mxu1  ;;  %2813 = vmatprep.mubr.msk.bf16.mxu0 %vm1080_vm1, %v1738_v53  ;;  %v3036_v53 = vld [vmem:[%s3739_s0] sm:$0xff] }
 0x4ae   :  { %v1741_v58 = vpack.c.bf16 %v2794_v57, %v2793_v54  ;;  %v1616_v59 = vpop.f32.mrb[35].mxu1  ;;  %2814 = vmatmul.mubr.msk.bf16.vlgmr.msra.gmra.mrb[40].mxu0 %vm1080_vm1, %v1739_v47  ;;  %v3035_v47 = vld [vmem:[%s3739_s0 + $0x10] sm:$0xff]  ;;  %v3037_v57 = vld [vmem:[%s3739_s0 + $0x18] sm:$0xff] }
 0x4af   :  { %v1740_v60 = vpack.c.bf16 %v1616_v59, %v1613_v55  ;;  %2824 = vmatpush3.bf16.msra.mxu0 %v2917_v42  ;;  %v3038_v59 = vld [vmem:[%s3739_s0 + $0x8] sm:$0xff] }
 0x4b1   :  { %2819 = vmatprep.mubr.msk.bf16.mxu1 %vm1080_vm1, %v1740_v60 }
 0x4b2   :  { %2820 = vmatmul.mubr.msk.bf16.vlgmr.msra.gmra.mrb[40].mxu1 %vm1080_vm1, %v1741_v58 }
 0x4b3   :  { %2830 = vmatpush3.bf16.msra.mxu1 %v2918_v46 }
 0x4b4   :  { %v2801_v62 = vpop.f32.mrb[36].mxu0 }
 0x4b5   :  { %v1668_v63 = vpop.f32.mrb[37].mxu0 }
 0x4b6   :  { %v2802_v0 = vpop.f32.mrb[38].mxu0 }
 0x4b7   :  { %v1743_v1 = vpack.c.bf16 %v2802_v0, %v2801_v62  ;;  %v1671_v3 = vpop.f32.mrb[39].mxu0 }
 0x4b8   :  { %v1742_v4 = vpack.c.bf16 %v1671_v3, %v1668_v63 }
 0x4ba   :  { %2825 = vmatprep.mubr.msk.bf16.mxu0 %vm1080_vm1, %v1742_v4 }
 0x4bb   :  { %v2809_v5 = vpop.f32.mrb[36].mxu1  ;;  %2826 = vmatmul.mubr.msk.bf16.vlgmr.msra.gmra.mrb[44].mxu0 %vm1080_vm1, %v1743_v1 }
 0x4bc   :  { %v1723_v6 = vpop.f32.mrb[37].mxu1 }
 0x4bd   :  { %v2810_v8 = vpop.f32.mrb[38].mxu1 }
 0x4be   :  { %v1745_v10 = vpack.c.bf16 %v2810_v8, %v2809_v5  ;;  %v1726_v11 = vpop.f32.mrb[39].mxu1  ;;  %v2921_v8 = vld [vmem:[%s3743_s4 + $0x4] ss:$8 sps:$4 sm:$0xff]  }
 0x4bf   :  { %v1744_v12 = vpack.c.bf16 %v1726_v11, %v1723_v6  ;;  %2129 = vmatprep.subr.bf16.mxu0 %v2921_v8  ;;  %v2924_v11 = vld [vmem:[%s3743_s4 + $0x14] ss:$8 sps:$4 sm:$0xff]  }
 0x4c1   :  { %2831 = vmatprep.mubr.msk.bf16.mxu1 %vm1080_vm1, %v1744_v12  ;;  %v2922_v12 = vld [vmem:[%s3743_s4 + $0x10] ss:$8 sps:$4 sm:$0xff]  }
 0x4c2   :  { %2832 = vmatmul.mubr.msk.bf16.vlgmr.msra.gmra.mrb[44].mxu1 %vm1080_vm1, %v1745_v10  ;;  %v2919_v10 = vld [vmem:[%s3743_s4] ss:$8 sps:$4 sm:$0xff]  }
 0x4c3   :  { %2130 = vmatpush1.bf16.msra.mxu0 %v2919_v10 }
 0x4c4   :  { %2131 = vmatprep.subr.bf16.mxu0 %v2924_v11 }
 0x4c7   :  { %2132 = vmatpush1.bf16.msra.mxu0 %v2922_v12 }
 0x581   :  { %v2815_v14 = vpop.f32.mrb[40].mxu0 }
 0x582   :  { %v1800_v9 = vpop.f32.mrb[41].mxu0  ;;  %v2012_v15 = vsel %vm40_vm0, %v2815_v14, 0.0  ;;  %v2927_v14 = vld [vmem:[%s3743_s4 + $0x24] ss:$8 sps:$4 sm:$0xff]  }
 0x583   :  { %v2816_v16 = vpop.f32.mrb[42].mxu0  ;;  %v1998_v7 = vsel %vm40_vm0, %v1800_v9, 0.0  ;;  %v2925_v9 = vld [vmem:[%s3743_s4 + $0x20] ss:$8 sps:$4 sm:$0xff]   ;;  %2133 = vmatprep.subr.bf16.mxu0 %v2927_v14 }
 0x584   :  { %v1803_v18 = vpop.f32.mrb[43].mxu0  ;;  %v2019_v27 = vsel %vm40_vm0, %v2816_v16, 0.0  ;;  %2134 = vmatpush1.bf16.msra.mxu0 %v2925_v9  ;;  %v2928_v16 = vld [vmem:[%s3743_s4 + $0x30] ss:$8 sps:$4 sm:$0xff]  }
 0x585   :  { %v2821_v22 = vpop.f32.mrb[40].mxu1  ;;  %v2005_v20 = vsel %vm40_vm0, %v1803_v18, 0.0  ;;  %v2930_v18 = vld [vmem:[%s3743_s4 + $0x34] ss:$8 sps:$4 sm:$0xff]  }
 0x586   :  { %v2013_v56 = vsel %vm40_vm0, %v2821_v22, 0.0  ;;  %v1861_v24 = vpop.f32.mrb[41].mxu1  ;;  %v3063_v22 = vmov 0   ;;  %2135 = vmatprep.subr.bf16.mxu0 %v2930_v18 }
 0x587   :  { %v2014_v13 = vadd.f32 %v2013_v56, %v2012_v15  ;;  %v1999_v25 = vsel %vm40_vm0, %v1861_v24, 0.0  ;;  %v2822_v52 = vpop.f32.mrb[42].mxu1  ;;  %2161 = vmatprep.mubr.bf16.mxu0 %v3063_v22 }
 0x588   :  { %v2000_v2 = vadd.f32 %v1999_v25, %v1998_v7  ;;  %v2020_v17 = vsel %vm40_vm0, %v2822_v52, 0.0  ;;  %v1864_v28 = vpop.f32.mrb[43].mxu1  ;;  %2136 = vmatpush1.bf16.msra.mxu0 %v2928_v16 }
 0x589   :  { %v2021_v26 = vadd.f32 %v2020_v17, %v2019_v27  ;;  %v2006_v61 = vsel %vm40_vm0, %v1864_v28, 0.0 }
 0x58a   :  { %v2007_v36 = vadd.f32 %v2006_v61, %v2005_v20 }
 0x58e   :  { %v2827_v29 = vpop.f32.mrb[44].mxu0 }
 0x58f   :  { %v2015_v30 = vsel %vm40_vm0, %v2827_v29, 0.0  ;;  %v1922_v19 = vpop.f32.mrb[45].mxu0  ;;  %v2454_v29 = vld [vmem:[%s3746_s7] ss:$0 sm:$0xff] }
 0x590   :  { %v2016_v33 = vadd.f32 %v2015_v30, %v2014_v13  ;;  %v2001_v34 = vsel %vm40_vm0, %v1922_v19, 0.0  ;;  %v2828_v39 = vpop.f32.mrb[46].mxu0 }
 0x591   :  { %v2002_v21 = vadd.f32 %v2001_v34, %v2000_v2  ;;  %v2022_v32 = vsel %vm40_vm0, %v2828_v39, 0.0  ;;  %v1925_v38 = vpop.f32.mrb[47].mxu0 }
 0x592   :  { %v2023_v41 = vadd.f32 %v2022_v32, %v2021_v26  ;;  %v2008_v23 = vsel %vm40_vm0, %v1925_v38, 0.0 }
 0x593   :  { %v2009_v37 = vadd.f32 %v2008_v23, %v2007_v36 }
 0x595   :  { %v2833_v40 = vpop.f32.mrb[44].mxu1 }
 0x596   :  { %v2017_v43 = vsel %vm40_vm0, %v2833_v40, 0.0  ;;  %v1983_v31 = vpop.f32.mrb[45].mxu1  ;;  %v2931_v40 = vld [vmem:[%s3744_s5] sm:$0xff]  }
 0x597   :  { %v2018_v35 = vadd.f32 %v2017_v43, %v2016_v33  ;;  %v2003_v44 = vsel %vm40_vm0, %v1983_v31, 0.0  ;;  %v2834_v45 = vpop.f32.mrb[46].mxu1  ;;  %2835 = vmatprep.subr.bf16.mxu1 %v2931_v40  ;;  %v2932_v43 = vld [vmem:[%s3744_s5 + $0x8] sm:$0xff]   ;;  %v2933_v31 = vld [vmem:[%s3744_s5 + $0x10] sm:$0xff]  }
 0x598   :  { %v2004_v42 = vadd.f32 %v2003_v44, %v2002_v21  ;;  %v2024_v46 = vsel %vm40_vm0, %v2834_v45, 0.0  ;;  %v1986_v48 = vpop.f32.mrb[47].mxu1  ;;  %2836 = vmatpush3.bf16.msra.mxu1 %v2931_v40  ;;  %v2935_v44 = vld [vmem:[%s3744_s5 + $0x20] sm:$0xff]   ;;  %v2936_v45 = vld [vmem:[%s3744_s5 + $0x28] sm:$0xff]  }
 0x599   :  { %v2025_v49 = vadd.f32 %v2024_v46, %v2023_v41  ;;  %v2010_v50 = vsel %vm40_vm0, %v1986_v48, 0.0  ;;  %v3633_v51 = vadd.f32 %v3035_v47, %v2018_v35  ;;  %2837 = vmatprep.subr.bf16.mxu1 %v2932_v43  ;;  %v2934_v35 = vld [vmem:[%s3744_s5 + $0x18] sm:$0xff]  }
 0x59a   :  { %v3638_v54 = vadd.f32 %v3036_v53, %v2004_v42  ;;  %v2011_v55 = vadd.f32 %v2010_v50, %v2009_v37  ;;  %v2937_v42 = vld [vmem:[%s3744_s5 + $0x30] sm:$0xff]   ;;  %v2938_v46 = vld [vmem:[%s3744_s5 + $0x38] sm:$0xff]   ;;  %s3064_s5 = smov [#allocation2]  }
 0x59b   :  { %v3643_v58 = vadd.f32 %v3037_v57, %v2025_v49  ;;  %v2033_v1 = vmul.f32 %v3633_v51, %v3633_v51  ;;  %s2342_s20 = sshll.u32 %s3064_s5, 4  ;;  %s2343_s20 = int_to_ptr.vmem [resolvable:$true] %s2342_s20 }
 0x59c   :  { %v3648_v60 = vadd.f32 %v3038_v59, %v2011_v55  ;;  %v2031_v62 = vmul.f32 %v3638_v54, %v3638_v54  ;;  %2838 = vmatpush3.bf16.msra.mxu1 %v2932_v43  ;;  %s3039_s21 = scalar_lea.vmem %s2343_s20, 512  ;;  %p3044_p1 = scmp.lt.s32.totalorder %s2343_s20, %s2343_s20 }
 0x59d   :  { %v2034_v4 = vmul.f32 %v3643_v58, %v3643_v58  ;;  %v2041_v5 = vsel %vm40_vm0, %v2033_v1, 0.0  ;;  %2839 = vmatprep.subr.bf16.mxu1 %v2933_v31  ;;  %p3040_p0 = scmp.ne.s32.totalorder %s2343_s20, %s3039_s21  ;;  %p3045_p2 = scmp.lt.s32.totalorder %s3039_s21, %s3039_s21 }
 0x59e   :  { %v2035_v63 = vsel %vm40_vm0, %v2031_v62, 0.0  ;;  %v2032_v0 = vmul.f32 %v3648_v60, %v3648_v60 }
 0x59f   :  { %2036 = vadd.xlane.f32.xlu0 %v2035_v63  ;;  %v2044_v6 = vsel %vm40_vm0, %v2034_v4, 0.0  ;;  %p3046_p3 = por %p3045_p2, %p3044_p1 }
 0x5a0   :  { %v2038_v3 = vsel %vm40_vm0, %v2032_v0, 0.0  ;;  %2840 = vmatpush3.bf16.msra.mxu1 %v2933_v31 }
 0x5a1   :  { %2039 = vadd.xlane.f32.xlu1 %v2038_v3  ;;  %2841 = vmatprep.subr.bf16.mxu1 %v2934_v35  ;;  %p3047_p4 = pnand %p3046_p3, %p3040_p0 }
 0x5a3   :  { %2042 = vadd.xlane.f32.xlu0 %v2041_v5 }
 0x5a4   :  { %2842 = vmatpush3.bf16.msra.mxu1 %v2934_v35 }
 0x5a5   :  { %2045 = vadd.xlane.f32.xlu1 %v2044_v6  ;;  %2843 = vmatprep.subr.bf16.mxu1 %v2935_v44 }
 0x5a8   :  { %2844 = vmatpush3.bf16.msra.mxu1 %v2935_v44 }
 0x5a9   :  { %2845 = vmatprep.subr.bf16.mxu1 %v2936_v45 }
 0x5ac   :  { %2846 = vmatpush3.bf16.msra.mxu1 %v2936_v45 }
 0x5ad   :  { %2847 = vmatprep.subr.bf16.mxu1 %v2937_v42 }
 0x5b0   :  { %2848 = vmatpush3.bf16.msra.mxu1 %v2937_v42 }
 0x5b1   :  { %2849 = vmatprep.subr.bf16.mxu1 %v2938_v46 }
 0x5b4   :  { %2850 = vmatpush3.bf16.msra.mxu1 %v2938_v46 }
 0x62c   :  { %v2037_v15 = vpop.xlane.xlu0 %2036 }
 0x62d   :  { %v2047_v56 = vmul.f32 0.015625, %v2037_v15 }
 0x62e   :  { %v2040_v24 = vpop.xlane.xlu1 %2039 }
 0x62f   :  { %v2051_v7 = vadd.f32 1e-06, %v2047_v56  ;;  %v2048_v13 = vmul.f32 0.015625, %v2040_v24 }
 0x630   :  { %v2043_v25 = vpop.xlane.xlu0 %2042 }
 0x631   :  { %3011 = vrsqrt.f32 %v2051_v7  ;;  %v2052_v52 = vadd.f32 1e-06, %v2048_v13  ;;  %v2049_v27 = vmul.f32 0.015625, %v2043_v25 }
 0x632   :  { %v2046_v2 = vpop.xlane.xlu1 %2045 }
 0x633   :  { %3013 = vrsqrt.f32 %v2052_v52  ;;  %v2053_v17 = vadd.f32 1e-06, %v2049_v27  ;;  %v2050_v28 = vmul.f32 0.015625, %v2046_v2 }
 0x635   :  { %v2054_v20 = vadd.f32 1e-06, %v2050_v28  ;;  %3015 = vrsqrt.f32 %v2053_v17 }
 0x637   :  { %3017 = vrsqrt.f32 %v2054_v20 }
 0x63b   :  { %v3012_v26 = vpop.eup %3011 }
 0x63c   :  { %v2059_v61 = vmul.f32 %v3012_v26, %v3638_v54 }
 0x63d   :  { %v3014_v36 = vpop.eup %3013 }
 0x63e   :  { %v2060_v30 = vmul.f32 %v3014_v36, %v3648_v60  ;;  %v2069_v33 = vmul.f32 %v2454_v29, %v2059_v61 }
 0x63f   :  { %v3016_v19 = vpop.eup %3015 }
 0x640   :  { %v2070_v34 = vmul.f32 %v2454_v29, %v2060_v30  ;;  %v2061_v38 = vmul.f32 %v3016_v19, %v3633_v51 }
 0x641   :  { %v3018_v39 = vpop.eup %3017 }
 0x642   :  { %v2073_v21 = vpack.c.bf16 %v2070_v34, %v2069_v33  ;;  %v2062_v32 = vmul.f32 %v3018_v39, %v3643_v58  ;;  %v2071_v23 = vmul.f32 %v2454_v29, %v2061_v38 }
 0x644   :  { %2463 = vmatmul.mubr.msk.bf16.vlgmr.msra.gmra.mrb[48].mxu0 %vm40_vm0, %v2073_v21  ;;  %v2072_v41 = vmul.f32 %v2454_v29, %v2062_v32 }
 0x645   :  { %2171 = vmatprep.mubr.bf16.mxu0 %v3063_v22 }
 0x646   :  { %v2074_v37 = vpack.c.bf16 %v2072_v41, %v2071_v23 }
 0x64c   :  { %2464 = vmatmul.mubr.msk.bf16.gmra.mrb[52].mxu0 %vm40_vm0, %v2074_v37 }
 0x717   :  { %v2163_v48 = vpop.f32.mrb[48].mxu0 }
 0x718   :  { %v2465_v49 = vmul.f32 -1.442695, %v2163_v48  ;;  %v2165_v50 = vpop.f32.mrb[49].mxu0 }
 0x719   :  { %v2167_v47 = vpop.f32.mrb[50].mxu0 }
 0x71a   :  { %3019 = vpow2.f32 %v2465_v49  ;;  %v2466_v53 = vmul.f32 -1.442695, %v2167_v47  ;;  %v2169_v55 = vpop.f32.mrb[51].mxu0 }
 0x71c   :  { %3021 = vpow2.f32 %v2466_v53 }
 0x71f   :  { %v2173_v57 = vpop.f32.mrb[52].mxu0 }
 0x720   :  { %v2467_v59 = vmul.f32 -1.442695, %v2173_v57  ;;  %v2175_v62 = vpop.f32.mrb[53].mxu0 }
 0x721   :  { %v2177_v63 = vpop.f32.mrb[54].mxu0 }
 0x722   :  { %3023 = vpow2.f32 %v2467_v59  ;;  %v2468_v0 = vmul.f32 -1.442695, %v2177_v63  ;;  %v2179_v1 = vpop.f32.mrb[55].mxu0 }
 0x724   :  { %v3020_v3 = vpop.eup %3019  ;;  %3025 = vpow2.f32 %v2468_v0 }
 0x725   :  { %v2194_v4 = vadd.f32 1.0, %v3020_v3 }
 0x726   :  { %v3022_v5 = vpop.eup %3021 }
 0x727   :  { %3027 = vrcp.f32 %v2194_v4  ;;  %v2195_v6 = vadd.f32 1.0, %v3022_v5 }
 0x729   :  { %3029 = vrcp.f32 %v2195_v6 }
 0x72c   :  { %v3024_v8 = vpop.eup %3023 }
 0x72d   :  { %v2196_v10 = vadd.f32 1.0, %v3024_v8 }
 0x72e   :  { %v3026_v11 = vpop.eup %3025 }
 0x72f   :  { %3031 = vrcp.f32 %v2196_v10  ;;  %v2197_v12 = vadd.f32 1.0, %v3026_v11 }
 0x731   :  { %v3028_v14 = vpop.eup %3027  ;;  %3033 = vrcp.f32 %v2197_v12 }
 0x732   :  { %v2206_v9 = vmul.f32 %v3028_v14, %v2163_v48 }
 0x733   :  { %v3030_v16 = vpop.eup %3029 }
 0x734   :  { %v2210_v18 = vmul.f32 %v2206_v9, %v2165_v50  ;;  %v2207_v22 = vmul.f32 %v3030_v16, %v2167_v47 }
 0x736   :  { %v2211_v15 = vmul.f32 %v2207_v22, %v2169_v55 }
 0x738   :  { %v2214_v56 = vpack.c.bf16 %v2211_v15, %v2210_v18 }
 0x739   :  { %v3032_v24 = vpop.eup %3031 }
 0x73a   :  { %v2208_v7 = vmul.f32 %v3032_v24, %v2173_v57  ;;  %2851 = vmatprep.mubr.bf16.mxu1 %v2214_v56 }
 0x73b   :  { %v3034_v13 = vpop.eup %3033 }
 0x73c   :  { %v2212_v25 = vmul.f32 %v2208_v7, %v2175_v62  ;;  %v2209_v52 = vmul.f32 %v3034_v13, %v2177_v63 }
 0x73e   :  { %v2213_v27 = vmul.f32 %v2209_v52, %v2179_v1 }
 0x740   :  { %v2215_v2 = vpack.c.bf16 %v2213_v27, %v2212_v25 }
 0x742   :  { %2852 = vmatmul.mubr.bf16.vlgmr.msra.gmra.mrb[48].mxu1 %v2215_v2 }
 0x815   :  { %v2853_v17 = vpop.f32.mrb[48].mxu1 }
 0x816   :  { %v2331_v28 = vadd.f32 %v2853_v17, %v3633_v51  ;;  %v2314_v20 = vpop.f32.mrb[49].mxu1 }
 0x817   :  { %v2329_v26 = vadd.f32 %v2314_v20, %v3638_v54  ;;  %v2854_v61 = vpop.f32.mrb[50].mxu1 }
 0x818   :  { %2335 = vst.msk [vmem:[#allocation2 + $0x10] sm:$0xff] %vm40_vm0, %v2331_v28  ;;  %v2332_v36 = vadd.f32 %v2854_v61, %v3643_v58  ;;  %v2317_v29 = vpop.f32.mrb[51].mxu1 }
 0x819   :  { %2333 = vst.msk [vmem:[#allocation2] sm:$0xff] %vm40_vm0, %v2329_v26  ;;  %v2330_v30 = vadd.f32 %v2317_v29, %v3648_v60 }
 0x81a   :  { %2336 = vst.msk [vmem:[#allocation2 + $0x18] sm:$0xff] %vm40_vm0, %v2332_v36 }
 0x81b   :  { %2334 = vst.msk [vmem:[#allocation2 + $0x8] sm:$0xff] %vm40_vm0, %v2330_v30 }
 0x81c   :  { %3050 = shalt.err (!%p3047_p4)
}
 0x81d   :  { %s3051_s24 = scalar_lea.hbm %s3747_s8, 512 }
 0x81e   :  { %p3052_p5 = scmp.ne.s32.totalorder %s3747_s8, %s3051_s24  ;;  %p3055_p6 = scmp.lt.u32.totalorder %s3051_s24, %s3747_s8 }
 0x820   :  { %p3057_p7 = pnand %p3055_p6, %p3052_p5 }
 0x822   :  { %3060 = shalt.err (!%p3057_p7)
}
 0x823   :  { %s3065_s28 = smov 128   ;;  %s3066_s29 = smov 8  }
 0x824   :  { %2348 = dma.vmem_to_hbm [thread:$0]  %s2343_s20, 512, %s3747_s8, [#allocation3], %s3065_s28, %s3065_s28, %s3066_s29  }
 0x825   :  { %3061 = dma.done.wait [#allocation3], 512  }
 0x826   :  { %3062 = vsyncadd [#allocation3], 4294966784 }
 0x827   :  { %2352 = vsyncpa [#allocation3], 1 }

</bundles_post_ra>
